<compile_context>
chip_gen: v7x
topology: tpu7x:2x2x1
jax: 0.10.0
libtpu: 0.0.40
codegen_flags: <defaults>
</compile_context>

<pallas_src>
import functools

import jax
import jax.numpy as jnp
from jax import lax
from jax.experimental import pallas as pl
from jax.experimental.pallas import tpu as pltpu

EPS = 1e-5


@functools.lru_cache(maxsize=None)
def _vmem_limit():
    # Generation-aware scoped-VMEM budget: ~half of physical VMEM
    # (v5e/v6e: 128 MiB -> 64 MiB limit; v7x: 64 MiB -> 32 MiB limit).
    try:
        cap = int(pltpu.get_tpu_info().vmem_capacity_bytes)
    except Exception:
        cap = 128 << 20
    return int(min(cap // 2, 64 << 20))


def _choose_tm(m):
    # Large M tiles amortize the ~0.35us/step overhead; full-extent block for
    # tiny M (always a legal block shape).  Ragged last block is masked.
    if m >= 2048:
        return 1024
    if m >= 512:
        return 512
    if m >= 256:
        return 256
    if m >= 128:
        return 128
    return m


def _fold_bn(p, cout):
    # Eval-mode BatchNorm folded into a per-channel scale/bias (conv bias absorbed).
    if 'gamma' in p:
        scale = p['gamma'] / jnp.sqrt(p['var'] + EPS)
        bias = p['beta'] + (p['b'] - p['mean']) * scale
    else:
        scale = jnp.ones((cout,), jnp.float32)
        bias = p['b']
    return scale.astype(jnp.float32), bias.astype(jnp.float32)


# --------------------------------------------------------------------------
# Fused 1x1-conv GEMM kernel (bf16 MXU, f32 epilogue, bf16 store)
# --------------------------------------------------------------------------
def _mm_kernel(a_ref, w_ref, s_ref, b_ref, o_ref, *, relu):
    acc = jnp.dot(a_ref[...], w_ref[...], preferred_element_type=jnp.float32)
    out = acc * s_ref[...] + b_ref[...]
    if relu:
        out = jnp.maximum(out, 0.0)
    o_ref[...] = out.astype(o_ref.dtype)


@functools.lru_cache(maxsize=None)
def _build_mm_call(M, K, N, tm, tn, relu, out_dtype):
    kernel = functools.partial(_mm_kernel, relu=relu)
    osz = jnp.dtype(out_dtype).itemsize
    cost = pl.CostEstimate(
        flops=2 * M * K * N, transcendentals=0,
        bytes_accessed=M * K * 2 + K * N * 2 + M * N * osz + 2 * N * 4)
    return pl.pallas_call(
        kernel,
        out_shape=jax.ShapeDtypeStruct((M, N), out_dtype),
        grid=(pl.cdiv(M, tm), N // tn),
        in_specs=[
            pl.BlockSpec((tm, K), lambda i, j: (i, 0)),   # A tile (ragged edge masked)
            pl.BlockSpec((K, tn), lambda i, j: (0, j)),   # weight column block
            pl.BlockSpec((1, tn), lambda i, j: (0, j)),   # folded BN scale
            pl.BlockSpec((1, tn), lambda i, j: (0, j)),   # folded BN bias
        ],
        out_specs=pl.BlockSpec((tm, tn), lambda i, j: (i, j)),
        compiler_params=pltpu.CompilerParams(
            dimension_semantics=("parallel", "parallel"),
            vmem_limit_bytes=_vmem_limit()),
        cost_estimate=cost,
    )


def conv1x1_bn_act(x, p, relu=True, out_dtype=jnp.bfloat16):
    """1x1 Conv + folded BN + optional ReLU on NHWC input -> NHWC bf16."""
    B, H, W, Cin = x.shape
    cout = p['w'].shape[0]
    a = x.reshape(B * H * W, Cin).astype(jnp.bfloat16)
    wmat = jnp.transpose(p['w'], (2, 3, 1, 0)).reshape(Cin, cout).astype(jnp.bfloat16)
    scale, bias = _fold_bn(p, cout)
    M, K, N = B * H * W, Cin, cout
    if K < 16:  # only the 3-channel stem conv; keep the MXU path well-formed
        a = jnp.pad(a, ((0, 0), (0, 16 - K)))
        wmat = jnp.pad(wmat, ((0, 16 - K), (0, 0)))
        K = 16
    tm = _choose_tm(M)
    tn = 512 if (N > 512 and N % 512 == 0) else N
    y = _build_mm_call(M, K, N, tm, tn, bool(relu), out_dtype)(
        a, wmat, scale.reshape(1, N), bias.reshape(1, N))
    return y.reshape(B, H, W, cout)


# --------------------------------------------------------------------------
# Direct (implicit-GEMM) KxK dilated convolution kernel — no HBM im2col.
# One grid step per batch image: padded image lives in VMEM; for each output
# row, the kh*kw taps are gathered by VMEM slices and fed to the MXU.
# --------------------------------------------------------------------------
def _dconv_kernel(x_ref, w_ref, s_ref, b_ref, o_ref, *,
                  kh, kw, dh, dw, ho, wo, cout, relu):
    s = s_ref[...]                  # (1, cout) f32
    b = b_ref[...]                  # (1, cout) f32

    def row(h, carry):
        acc = jnp.zeros((wo, cout), jnp.float32)
        for i in range(kh):
            for j in range(kw):
                patch = x_ref[h + i * dh, pl.ds(j * dw, wo), :]      # (wo, Cin) bf16
                acc = acc + jnp.dot(patch, w_ref[i * kw + j],
                                    preferred_element_type=jnp.float32)
        out = acc * s + b
        if relu:
            out = jnp.maximum(out, 0.0)
        o_ref[h, :, :] = out.astype(o_ref.dtype)
        return carry

    lax.fori_loop(0, ho, row, 0)


@functools.lru_cache(maxsize=None)
def _build_dconv_call(B, Hp, Wp, Cin, Cout, kh, kw, dh, dw, ho, wo, relu):
    kernel = functools.partial(_dconv_kernel, kh=kh, kw=kw, dh=dh, dw=dw,
                               ho=ho, wo=wo, cout=Cout, relu=relu)
    cost = pl.CostEstimate(
        flops=2 * B * ho * wo * kh * kw * Cin * Cout,
        transcendentals=0,
        bytes_accessed=(B * Hp * Wp * Cin * 2 + B * ho * wo * Cout * 2
                        + kh * kw * Cin * Cout * 2 + 2 * Cout * 4))
    return pl.pallas_call(
        kernel,
        out_shape=jax.ShapeDtypeStruct((B, ho, wo, Cout), jnp.bfloat16),
        grid=(B,),
        in_specs=[
            pl.BlockSpec((None, Hp, Wp, Cin), lambda b: (b, 0, 0, 0)),  # padded image
            pl.BlockSpec((kh * kw, Cin, Cout), lambda b: (0, 0, 0)),    # tap weights
            pl.BlockSpec((1, Cout), lambda b: (0, 0)),                  # BN scale
            pl.BlockSpec((1, Cout), lambda b: (0, 0)),                  # BN bias
        ],
        out_specs=pl.BlockSpec((None, ho, wo, Cout), lambda b: (b, 0, 0, 0)),
        compiler_params=pltpu.CompilerParams(
            dimension_semantics=("parallel",),
            vmem_limit_bytes=_vmem_limit()),
        cost_estimate=cost,
    )


def conv_kxk_bn_act(x, p, kh, kw, dil=(1, 1), pad=(0, 0), relu=True):
    """Dilated KxK (or 1xK / Kx1) Conv + folded BN + ReLU, implicit im2col."""
    B, H, W, Cin = x.shape
    cout = p['w'].shape[0]
    dh, dw = dil
    ph, pw = pad
    xp = jnp.pad(x.astype(jnp.bfloat16), ((0, 0), (ph, ph), (pw, pw), (0, 0)))
    Hp, Wp = H + 2 * ph, W + 2 * pw
    ho = Hp - dh * (kh - 1)
    wo = Wp - dw * (kw - 1)
    wmat = jnp.transpose(p['w'], (2, 3, 1, 0)).reshape(kh * kw, Cin, cout)
    wmat = wmat.astype(jnp.bfloat16)
    scale, bias = _fold_bn(p, cout)
    y = _build_dconv_call(B, Hp, Wp, Cin, cout, kh, kw, dh, dw, ho, wo, bool(relu))(
        xp, wmat, scale.reshape(1, cout), bias.reshape(1, cout))
    return y


# --------------------------------------------------------------------------
# Fused SPRM / GFEM tail: reduce(concat(5 branches)) + short(x0) + ReLU,
# all in one kernel (no concat / x_res / x_ HBM round trips).
# --------------------------------------------------------------------------
def _reduce_short_kernel(a1, a2, a3, a4, a5, a0, wr, ws, sr, br, ss, bs, o_ref):
    acc = jnp.dot(a1[...], wr[0], preferred_element_type=jnp.float32)
    acc = acc + jnp.dot(a2[...], wr[1], preferred_element_type=jnp.float32)
    acc = acc + jnp.dot(a3[...], wr[2], preferred_element_type=jnp.float32)
    acc = acc + jnp.dot(a4[...], wr[3], preferred_element_type=jnp.float32)
    acc = acc + jnp.dot(a5[...], wr[4], preferred_element_type=jnp.float32)
    xr = jnp.maximum(acc * sr[...] + br[...], 0.0)
    acc0 = jnp.dot(a0[...], ws[...], preferred_element_type=jnp.float32)
    xs = jnp.maximum(acc0 * ss[...] + bs[...], 0.0)
    o_ref[...] = jnp.maximum(xr + xs, 0.0).astype(o_ref.dtype)


@functools.lru_cache(maxsize=None)
def _build_reduce_short_call(M, C, tm):
    act = pl.BlockSpec((tm, C), lambda i: (i, 0))
    cst = pl.BlockSpec((1, C), lambda i: (0, 0))
    cost = pl.CostEstimate(
        flops=2 * M * C * C * 6, transcendentals=0,
        bytes_accessed=6 * M * C * 2 + 6 * C * C * 2 + M * C * 2 + 4 * C * 4)
    return pl.pallas_call(
        _reduce_short_kernel,
        out_shape=jax.ShapeDtypeStruct((M, C), jnp.bfloat16),
        grid=(pl.cdiv(M, tm),),
        in_specs=[act] * 6 + [
            pl.BlockSpec((5, C, C), lambda i: (0, 0, 0)),   # stacked reduce weights
            pl.BlockSpec((C, C), lambda i: (0, 0)),         # short weight
            cst, cst, cst, cst,                             # BN scale/bias pairs
        ],
        out_specs=act,
        compiler_params=pltpu.CompilerParams(
            dimension_semantics=("parallel",),
            vmem_limit_bytes=_vmem_limit()),
        cost_estimate=cost,
    )


def reduce_short_fused(branches, x0, p_reduce, p_short):
    """relu( BNReLU(concat(branches) @ Wr) + BNReLU(x0 @ Ws) )  (all 1x1)."""
    B, H, W, C = x0.shape
    M = B * H * W
    tm = _choose_tm(M)
    cout = p_reduce['w'].shape[0]
    wr = jnp.transpose(p_reduce['w'], (2, 3, 1, 0)).reshape(5, C, cout)
    wr = wr.astype(jnp.bfloat16)
    ws = jnp.transpose(p_short['w'], (2, 3, 1, 0)).reshape(C, cout).astype(jnp.bfloat16)
    sr, br = _fold_bn(p_reduce, cout)
    ss, bs = _fold_bn(p_short, cout)
    flat = [t.reshape(M, C).astype(jnp.bfloat16) for t in branches]
    flat.append(x0.reshape(M, C).astype(jnp.bfloat16))
    y = _build_reduce_short_call(M, C, tm)(
        *flat, wr, ws, sr.reshape(1, cout), br.reshape(1, cout),
        ss.reshape(1, cout), bs.reshape(1, cout))
    return y.reshape(B, H, W, cout)


# --------------------------------------------------------------------------
# Fused decoder level: reduce3(cat(prev,y)) + residual + SE, in one kernel.
#   out = prev + relu(BN(prev@W1 + y@W2)) + y*(gate+1)
# --------------------------------------------------------------------------
def _level_fuse_kernel(prev_ref, y_ref, w1_ref, w2_ref, s_ref, b_ref, g_ref, o_ref):
    prev = prev_ref[...]
    y = y_ref[...]
    acc = jnp.dot(prev, w1_ref[...], preferred_element_type=jnp.float32)
    acc = acc + jnp.dot(y, w2_ref[...], preferred_element_type=jnp.float32)
    r = jnp.maximum(acc * s_ref[...] + b_ref[...], 0.0)
    out = prev.astype(jnp.float32) + r + y.astype(jnp.float32) * g_ref[...]
    o_ref[...] = out.astype(o_ref.dtype)


@functools.lru_cache(maxsize=None)
def _build_level_fuse_call(B, M, C, tm):
    act = pl.BlockSpec((None, tm, C), lambda b, i: (b, i, 0))
    wspec = pl.BlockSpec((C, C), lambda b, i: (0, 0))
    cst = pl.BlockSpec((1, C), lambda b, i: (0, 0))
    cost = pl.CostEstimate(
        flops=4 * B * M * C * C + 4 * B * M * C, transcendentals=0,
        bytes_accessed=2 * B * M * C * 2 + 2 * C * C * 2 + B * M * C * 4 + 3 * C * 4)
    return pl.pallas_call(
        _level_fuse_kernel,
        out_shape=jax.ShapeDtypeStruct((B, M, C), jnp.float32),
        grid=(B, pl.cdiv(M, tm)),
        in_specs=[act, act, wspec, wspec, cst, cst,
                  pl.BlockSpec((None, 1, C), lambda b, i: (b, 0, 0))],
        out_specs=act,
        compiler_params=pltpu.CompilerParams(
            dimension_semantics=("parallel", "parallel"),
            vmem_limit_bytes=_vmem_limit()),
        cost_estimate=cost,
    )


def level_fuse(prev_up, y, p_reduce3, p_se):
    B, H, W, C = y.shape
    M = H * W
    tm = _choose_tm(M)
    cout = p_reduce3['w'].shape[0]
    wmat = jnp.transpose(p_reduce3['w'], (2, 3, 1, 0)).reshape(2 * C, cout)
    w1 = wmat[:C].astype(jnp.bfloat16)      # pairs with prev_up (concat order)
    w2 = wmat[C:].astype(jnp.bfloat16)      # pairs with y
    s, b = _fold_bn(p_reduce3, cout)
    gate = (se_gate(p_se, y) + 1.0).astype(jnp.float32)      # (B, C): SE gate + 1
    prev3 = prev_up.reshape(B, M, C).astype(jnp.bfloat16)
    y3 = y.reshape(B, M, C).astype(jnp.bfloat16)
    out = _build_level_fuse_call(B, M, C, tm)(
        prev3, y3, w1, w2, s.reshape(1, cout), b.reshape(1, cout),
        gate.reshape(B, 1, C))
    return out.reshape(B, H, W, C)


# --------------------------------------------------------------------------
# Score head (Conv2d(channel, 1, 1)): lane-reduction kernel, no N padding.
# --------------------------------------------------------------------------
def _score_kernel(a_ref, w_ref, b_ref, o_ref):
    a = a_ref[...].astype(jnp.float32)
    acc = jnp.sum(a * w_ref[...], axis=-1, keepdims=True)     # (tm, 1)
    o_ref[...] = acc + b_ref[...]


@functools.lru_cache(maxsize=None)
def _build_score_call(M, K, tm, in_itemsize):
    cost = pl.CostEstimate(flops=2 * M * K, transcendentals=0,
                           bytes_accessed=M * K * in_itemsize + K * 4 + M * 4)
    return pl.pallas_call(
        _score_kernel,
        out_shape=jax.ShapeDtypeStruct((M, 1), jnp.float32),
        grid=(pl.cdiv(M, tm),),
        in_specs=[
            pl.BlockSpec((tm, K), lambda i: (i, 0)),
            pl.BlockSpec((1, K), lambda i: (0, 0)),
            pl.BlockSpec((1, 1), lambda i: (0, 0)),
        ],
        out_specs=pl.BlockSpec((tm, 1), lambda i: (i, 0)),
        compiler_params=pltpu.CompilerParams(
            dimension_semantics=("parallel",),
            vmem_limit_bytes=_vmem_limit()),
        cost_estimate=cost,
    )


def score_head(x, p):
    B, H, W, C = x.shape
    M = B * H * W
    tm = _choose_tm(M)
    a = x.reshape(M, C)
    w = p['w'].reshape(1, C).astype(jnp.float32)
    b = p['b'].reshape(1, 1).astype(jnp.float32)
    y = _build_score_call(M, C, tm, int(jnp.dtype(a.dtype).itemsize))(a, w, b)
    return y.reshape(B, H, W, 1)


# --------------------------------------------------------------------------
# Glue ops (plain JAX)
# --------------------------------------------------------------------------
def bilinear_resize(x, oh, ow, out_dtype=None):
    """F.interpolate(..., mode='bilinear', align_corners=True) on NHWC."""
    B, H, W, C = x.shape
    out_dtype = out_dtype or x.dtype
    if (H, W) == (oh, ow):
        return x.astype(out_dtype)

    def mat(on, inn):
        if on > 1:
            src = jnp.arange(on, dtype=jnp.float32) * ((inn - 1) / (on - 1))
        else:
            src = jnp.zeros((on,), jnp.float32)
        lo = jnp.clip(jnp.floor(src).astype(jnp.int32), 0, inn - 1)
        hi = jnp.clip(lo + 1, 0, inn - 1)
        frac = src - lo.astype(jnp.float32)
        m = jnp.zeros((on, inn), jnp.float32)
        m = m.at[jnp.arange(on), lo].add(1.0 - frac)
        m = m.at[jnp.arange(on), hi].add(frac)
        return m

    Rh = mat(oh, H)
    Rw = mat(ow, W)
    y = jnp.einsum('oh,bhwc->bowc', Rh, x.astype(jnp.float32))
    y = jnp.einsum('pw,bhwc->bhpc', Rw, y)
    return y.astype(out_dtype)


def se_gate(p, x):
    # SE: global-avg-pool -> FC -> ReLU -> FC -> sigmoid (tiny; plain JAX)
    y = jnp.mean(x.astype(jnp.float32), axis=(1, 2))   # (B, C)
    y = jnp.maximum(y @ p['w1'].T, 0.0)                 # (B, hidden)
    y = jax.nn.sigmoid(y @ p['w2'].T)                   # (B, C)
    return y


# --------------------------------------------------------------------------
# Parameters (deterministic synthetic init, matching module __init__ shapes)
# --------------------------------------------------------------------------
class KeyGen:
    def __init__(self, key):
        self.key = key

    def __call__(self):
        self.key, sub = jax.random.split(self.key)
        return sub


def conv_p(kg, cin, cout, kh, kw, bn=True):
    p = {
        'w': 0.01 * jax.random.normal(kg(), (cout, cin, kh, kw), jnp.float32),
        'b': jnp.zeros((cout,), jnp.float32),
    }
    if bn:
        p.update(gamma=jnp.ones((cout,), jnp.float32),
                 beta=jnp.zeros((cout,), jnp.float32),
                 mean=jnp.zeros((cout,), jnp.float32),
                 var=jnp.ones((cout,), jnp.float32))
    return p


def sprm_p(kg, cin, co):
    return dict(
        convert=conv_p(kg, cin, co, 1, 1),
        b1=conv_p(kg, co, co, 3, 3), b2=conv_p(kg, co, co, 3, 3),
        b3=conv_p(kg, co, co, 3, 3), b4=conv_p(kg, co, co, 3, 3),
        b5=conv_p(kg, co, co, 3, 3),
        reduce=conv_p(kg, co * 5, co, 1, 1),
        short=conv_p(kg, co, co, 1, 1))


def gfem_p(kg, cin, co):
    return dict(
        convert=conv_p(kg, cin, co, 1, 1),
        b1a=conv_p(kg, co, co, 1, 3), b1b=conv_p(kg, co, co, 3, 1),
        b2=conv_p(kg, co, co, 3, 3),
        b3a=conv_p(kg, co, co, 1, 5), b3b=conv_p(kg, co, co, 5, 1),
        b4=conv_p(kg, co, co, 3, 3),
        b5a=conv_p(kg, co, co, 1, 7), b5b=conv_p(kg, co, co, 7, 1),
        b6=conv_p(kg, co, co, 3, 3),
        b7a=conv_p(kg, co, co, 1, 9), b7b=conv_p(kg, co, co, 9, 1),
        b8=conv_p(kg, co, co, 3, 3),
        reduce=conv_p(kg, co * 5, co, 1, 1),
        short=conv_p(kg, co, co, 1, 1))


def se_p(kg, c, reduction):
    hidden = max(c // reduction, 1)  # SE(channel, channel) -> hidden = 1 (as in reference)
    return {'w1': 0.01 * jax.random.normal(kg(), (hidden, c), jnp.float32),
            'w2': 0.01 * jax.random.normal(kg(), (c, hidden), jnp.float32)}


def sprnet_params(key, channel):
    kg = KeyGen(key)
    backbone = [conv_p(kg, cin, cout, 1, 1, bn=False)
                for cin, cout in [(3, 64), (64, 256), (256, 512),
                                  (512, 1024), (1024, 2048)]]
    return dict(
        backbone=backbone,
        sprm1=sprm_p(kg, 2048, channel),
        sprm2=sprm_p(kg, 1024, channel),
        sprm3=sprm_p(kg, 512, channel),
        sprm4=sprm_p(kg, 256, channel),
        sprm5=sprm_p(kg, 64, channel),
        gfem=gfem_p(kg, 2048, channel),
        se=se_p(kg, channel, channel),
        reduce=conv_p(kg, channel, 1, 1, 1, bn=False),     # Conv2d(channel, 1, 1)
        reduce3=conv_p(kg, channel * 2, channel, 1, 1),    # used at every level
        # reduce1 / reduce2 / reduce4 are defined in __init__ but unused in forward
    )


# --------------------------------------------------------------------------
# Sub-module forwards
# --------------------------------------------------------------------------
def backbone_fwd(ps, x):
    # TODO(synk): stand-in for ResNet50 (class not provided); strided subsample +
    #             1x1 conv + ReLU per stage with correct channel counts / strides.
    feats = []
    cur = x
    for p in ps:
        cur = cur[:, ::2, ::2, :]
        cur = conv1x1_bn_act(cur, p, relu=True)
        feats.append(cur)
    return feats  # x1(64,/2), x2(256,/4), x3(512,/8), x4(1024,/16), x5(2048,/32)


def sprm_fwd(p, x):
    x0 = conv1x1_bn_act(x, p['convert'])
    x1 = conv_kxk_bn_act(x0, p['b1'], 3, 3, (1, 1), (1, 1))
    s = x0 + x1                                   # cumulative prefix sums
    x2 = conv_kxk_bn_act(s, p['b2'], 3, 3, (2, 2), (2, 2))
    s = s + x2
    x3 = conv_kxk_bn_act(s, p['b3'], 3, 3, (4, 4), (4, 4))
    s = s + x3
    x4 = conv_kxk_bn_act(s, p['b4'], 3, 3, (6, 6), (6, 6))
    s = s + x4
    x5 = conv_kxk_bn_act(s, p['b5'], 3, 3, (8, 8), (8, 8))
    return reduce_short_fused([x1, x2, x3, x4, x5], x0, p['reduce'], p['short'])


def gfem_fwd(p, x):
    x0 = conv1x1_bn_act(x, p['convert'])
    x1_ = conv_kxk_bn_act(conv_kxk_bn_act(x0, p['b1a'], 1, 3, (1, 1), (0, 1)),
                          p['b1b'], 3, 1, (1, 1), (1, 0))
    x1 = conv_kxk_bn_act(x1_, p['b2'], 3, 3, (3, 3), (3, 3))
    x2_ = conv_kxk_bn_act(conv_kxk_bn_act(x1_ + x0, p['b3a'], 1, 5, (1, 1), (0, 2)),
                          p['b3b'], 5, 1, (1, 1), (2, 0))
    x2 = conv_kxk_bn_act(x1 + x2_, p['b4'], 3, 3, (5, 5), (5, 5))
    x3_ = conv_kxk_bn_act(conv_kxk_bn_act(x2_ + x0, p['b5a'], 1, 7, (1, 1), (0, 3)),
                          p['b5b'], 7, 1, (1, 1), (3, 0))
    x3 = conv_kxk_bn_act(x2 + x3_, p['b6'], 3, 3, (7, 7), (7, 7))
    x4_ = conv_kxk_bn_act(conv_kxk_bn_act(x3_ + x0, p['b7a'], 1, 9, (1, 1), (0, 4)),
                          p['b7b'], 9, 1, (1, 1), (4, 0))
    x4 = conv_kxk_bn_act(x3 + x4_, p['b8'], 3, 3, (9, 9), (9, 9))
    return reduce_short_fused([x0, x1, x2, x3, x4], x0, p['reduce'], p['short'])


# --------------------------------------------------------------------------
# SPRNet forward
# --------------------------------------------------------------------------
def sprnet_fwd(params, x_nchw):
    x = jnp.transpose(x_nchw, (0, 2, 3, 1))  # NCHW -> NHWC
    x1, x2, x3, x4, x5 = backbone_fwd(params['backbone'], x)
    x_size = x.shape[1:3]
    sizes = [t.shape[1:3] for t in (x1, x2, x3, x4, x5)]

    y6 = gfem_fwd(params['gfem'], x5)
    f6 = score_head(y6, params['reduce'])
    score6 = bilinear_resize(f6, *x_size, out_dtype=jnp.float32)
    y6_5 = bilinear_resize(y6, *sizes[4], out_dtype=jnp.bfloat16)

    def level(prev_up, y):
        # f_ = add(prev_up, reduce3(cat(prev_up, y))) + se(y); f_ = add(y, f_)
        #    = prev_up + relu(BN(cat@W)) + y*(gate+1)       (single fused kernel)
        f_ = level_fuse(prev_up, y, params['reduce3'], params['se'])
        f = score_head(f_, params['reduce'])
        score = bilinear_resize(f, *x_size, out_dtype=jnp.float32)
        return f_, score

    y5 = sprm_fwd(params['sprm1'], x5)
    f5_, score5 = level(y6_5, y5)
    f5_4 = bilinear_resize(f5_, *sizes[3], out_dtype=jnp.bfloat16)

    y4 = sprm_fwd(params['sprm2'], x4)
    f4_, score4 = level(f5_4, y4)
    f4_3 = bilinear_resize(f4_, *sizes[2], out_dtype=jnp.bfloat16)

    y3 = sprm_fwd(params['sprm3'], x3)
    f3_, score3 = level(f4_3, y3)
    f3_2 = bilinear_resize(f3_, *sizes[1], out_dtype=jnp.bfloat16)

    y2 = sprm_fwd(params['sprm4'], x2)
    f2_, score2 = level(f3_2, y2)
    f2_1 = bilinear_resize(f2_, *sizes[0], out_dtype=jnp.bfloat16)

    y1 = sprm_fwd(params['sprm5'], x1)
    f1_, score1 = level(f2_1, y1)

    to_nchw = lambda t: jnp.transpose(t, (0, 3, 1, 2))
    return tuple(to_nchw(s) for s in (score1, score2, score3, score4, score5, score6))


# --------------------------------------------------------------------------
if __name__ == "__main__":
    # channel = 128: multiple of 128 so all channel-dim tiles are lane-dense
    # (PyTorch default is 192; kept small-ish for the demo).
    channel = 128
    key = jax.random.PRNGKey(0)
    pkey, xkey = jax.random.split(key)
    params = sprnet_params(pkey, channel)
    x = jax.random.normal(xkey, (2, 3, 64, 64), jnp.float32)  # NCHW like PyTorch

    scores = sprnet_fwd(params, x)
    scores = jax.block_until_ready(scores)

    assert len(scores) == 6
    for s in scores:
        assert s.shape == (2, 1, 64, 64), s.shape
        assert bool(jnp.all(jnp.isfinite(s)))
    print("KERNEL_OK")
</pallas_src>

<mosaic_0001>
module attributes {stable_mosaic.version = 11 : i64} {
  func.func @_mm_kernel(%arg0: i32, %arg1: i32, %arg2: memref<1024x16xbf16, #tpu.memory_space<vmem>>, %arg3: memref<16x64xbf16, #tpu.memory_space<vmem>>, %arg4: memref<1x64xf32, #tpu.memory_space<vmem>>, %arg5: memref<1x64xf32, #tpu.memory_space<vmem>>, %arg6: memref<1024x64xbf16, #tpu.memory_space<vmem>>) attributes {dimension_semantics = [#tpu.dimension_semantics<parallel>, #tpu.dimension_semantics<parallel>], iteration_bounds = array<i64: 2, 1>, scalar_prefetch = 0 : i64, scratch_operands = 0 : i64, tpu.core_type = #tpu.core_type<tc>, window_params = [{transform_indices = @transform_0, window_bounds = array<i64: 1024, 16>}, {transform_indices = @transform_1, window_bounds = array<i64: 16, 64>}, {transform_indices = @transform_2, window_bounds = array<i64: 1, 64>}, {transform_indices = @transform_3, window_bounds = array<i64: 1, 64>}, {transform_indices = @transform_4, window_bounds = array<i64: 1024, 64>}]} {
    %c0 = arith.constant 0 : index
    %c0_0 = arith.constant 0 : index
    %0 = vector.load %arg2[%c0, %c0_0] : memref<1024x16xbf16, #tpu.memory_space<vmem>>, vector<1024x16xbf16>
    %c0_1 = arith.constant 0 : index
    %c0_2 = arith.constant 0 : index
    %1 = vector.load %arg3[%c0_1, %c0_2] : memref<16x64xbf16, #tpu.memory_space<vmem>>, vector<16x64xbf16>
    %cst = arith.constant dense<0.000000e+00> : vector<1024x64xf32>
    %2 = tpu.matmul %0, %1, %cst {dimension_numbers = #tpu.dot_dimension_numbers<[1], [0], [0], [1], [0, 0, 1, 1], [], []>} : vector<1024x16xbf16>, vector<16x64xbf16>, vector<1024x64xf32> -> vector<1024x64xf32>
    %c0_3 = arith.constant 0 : index
    %c0_4 = arith.constant 0 : index
    %3 = vector.load %arg4[%c0_3, %c0_4] : memref<1x64xf32, #tpu.memory_space<vmem>>, vector<1x64xf32>
    %4 = vector.broadcast %3 : vector<1x64xf32> to vector<1024x64xf32>
    %5 = arith.mulf %2, %4 : vector<1024x64xf32>
    %c0_5 = arith.constant 0 : index
    %c0_6 = arith.constant 0 : index
    %6 = vector.load %arg5[%c0_5, %c0_6] : memref<1x64xf32, #tpu.memory_space<vmem>>, vector<1x64xf32>
    %7 = vector.broadcast %6 : vector<1x64xf32> to vector<1024x64xf32>
    %8 = arith.addf %5, %7 : vector<1024x64xf32>
    %cst_7 = arith.constant 0.000000e+00 : f32
    %9 = vector.broadcast %cst_7 : f32 to vector<1024x64xf32>
    %10 = arith.maximumf %8, %9 : vector<1024x64xf32>
    %11 = arith.truncf %10 : vector<1024x64xf32> to vector<1024x64xbf16>
    %c0_8 = arith.constant 0 : index
    %c0_9 = arith.constant 0 : index
    %12 = vector.load %arg6[%c0_8, %c0_9] : memref<1024x64xbf16, #tpu.memory_space<vmem>>, vector<1024x64xbf16>
    tpu.vector_store %arg6[%c0_8, %c0_9], %11 {strides = array<i32>} : memref<1024x64xbf16, #tpu.memory_space<vmem>>, vector<1024x64xbf16>,
    return
  }
  func.func @transform_0(%arg0: i32, %arg1: i32) -> (i32, i32) {
    %c0_i32 = arith.constant 0 : i32
    %c0_i32_0 = arith.constant 0 : i32
    return %arg0, %c0_i32 : i32, i32
  }
  func.func @transform_1(%arg0: i32, %arg1: i32) -> (i32, i32) {
    %c0_i32 = arith.constant 0 : i32
    %c0_i32_0 = arith.constant 0 : i32
    return %c0_i32, %arg1 : i32, i32
  }
  func.func @transform_2(%arg0: i32, %arg1: i32) -> (i32, i32) {
    %c0_i32 = arith.constant 0 : i32
    %c0_i32_0 = arith.constant 0 : i32
    return %c0_i32, %arg1 : i32, i32
  }
  func.func @transform_3(%arg0: i32, %arg1: i32) -> (i32, i32) {
    %c0_i32 = arith.constant 0 : i32
    %c0_i32_0 = arith.constant 0 : i32
    return %c0_i32, %arg1 : i32, i32
  }
  func.func @transform_4(%arg0: i32, %arg1: i32) -> (i32, i32) {
    %c0_i32 = arith.constant 0 : i32
    return %arg0, %arg1 : i32, i32
  }
}

</mosaic_0001>

<bundles_post_ra>
// kernel: tpu_custom_call.1
= control target key start
LH: loop header
LB: loop body
LE: loop exit
PB: predicated region body
PF: predicated region fallthrough
CT: control target
= control target key end

     0   :  { %9 = vsyncpa [#allocation3], 0  ;;  %s4615_s0 = inlined_call_operand.hbm [shape: bf16[2048,16], index: 0, kind: input, shape index: {}]   ;;  %s4616_s1 = inlined_call_operand.hbm [shape: bf16[16,64], index: 1, kind: input, shape index: {}]   ;;  %s4617_s2 = inlined_call_operand.hbm [shape: f32[1,64], index: 2, kind: input, shape index: {}]   ;;  %s4618_s3 = inlined_call_operand.hbm [shape: f32[1,64], index: 3, kind: input, shape index: {}]   ;;  %s4619_s4 = inlined_call_operand.hbm [shape: bf16[2048,64], index: 4, kind: output, shape index: {}]  }
   0x1   :  { %11 = vsyncpa [#allocation3 + $0x1], 0 }
   0x2   :  { %12 = vsyncpa [#allocation6], 0 }
   0x3   :  { %13 = vsyncpa [#allocation9], 0 }
   0x4   :  { %14 = vsyncpa [#allocation4], 0 }
   0x5   :  { %16 = vsyncpa [#allocation4 + $0x1], 0  ;;  %s3671_s15 = smov 0   ;;  %s3673_s16 = smov 0  }
   0x6   :  { %s3675_s17 = smov 0   ;;  %s3677_s18 = smov 0  }
   0x7   :  { %s3679_s19 = smov 0   ;;  %s3681_s20 = smov 0  }
   0x8 LB: > { %s2660_s21 = sadd.s32 4294967295, %s3635_s20   ;;  %s2661_s22 = sadd.s32 4294967294, %s3635_s20   ;;  %s3635_s20 = sphi %s3681_s20, %s22_s20   ;;  %s3631_s19 = sphi %s3679_s19, %s4646_s19   ;;  %s3627_s18 = sphi %s3677_s18, %s4645_s18   ;;  %s3623_s17 = sphi %s3675_s17, %s4644_s17   ;;  %s3619_s16 = sphi %s3673_s16, %s4643_s16   ;;  %s3615_s15 = sphi %s3671_s15, %s4642_s15  }
   0x9   : > { %p54_p0 = scmp.ne.s32.totalorder %s3619_s16, %s3615_s15  ;;  %p3705_p1 = scmp.eq.s32.totalorder %s2660_s21, 0 }
   0xa   : > { %p3709_p2 = scmp.eq.s32.totalorder %s2660_s21, 1  ;;  %p164_p3 = scmp.eq.s32.totalorder %s2661_s22, 1 }
   0xb   : > { %s4625_s23 = scalar_select %p3705_p1, 1, 0 }
   0xc   : > { %s4626_s24 = scalar_select %p3709_p2, 1, 0 }
   0xd   : > { %p3715_p4 = por %p3705_p1, %p54_p0  ;;  %p2662_p5 = scmp.ge.s32.totalorder %s3635_s20, 1 }
   0xe   : > { %p3720_p6 = por %p164_p3, %p54_p0  ;;  %p171_p7 = scmp.lt.s32.totalorder %s3635_s20, 3 }
   0xf   : > { %s4627_s25 = scalar_select %p3715_p4, 1, 0 }
  0x10   : > { %s4628_s26 = scalar_select %p3720_p6, 1, 0 }
  0x11   : > { %p3725_p8 = pnand %p2662_p5, %p171_p7  ;;  %s3637_s28 = smov [#allocation5]  }
  0x12   : > { %4629 = sst [smem:[#allocation15_spill]] %s4628_s26  ;;  %s185_s29 = sshll.u32 %s3637_s28, 4  ;;  %s3729_s29 = int_to_ptr.vmem [resolvable:$true] %s185_s29 }
  0x13   : > { %s4630_s27 = scalar_select %p3725_p8, 1, 0 }
  0x14   : > { %p3283_p9 = pneg %p3725_p8  ;;  %s3638_s5 = smov [#allocation7]  }
  0x15   : > { %s201_s6 = sshll.u32 %s3638_s5, 4  ;;  %s3639_s7 = smov [#allocation8]   ;;  %s3740_s6 = int_to_ptr.vmem [resolvable:$true] %s201_s6 }
  0x16   : > { %p3736_p11 = pnand %p3283_p9, %p3705_p1  ;;  %s3742_s8 = sshll.u32 %s3639_s7, 4  ;;  %s215_s8 = int_to_ptr.vmem [resolvable:$true] %s3742_s8 }
  0x17   : > { %s3431_s11 = scalar_lea.hbm %s4616_s1, 128 }
  0x18   : > { %p3432_p12 = scmp.ne.s32.totalorder %s4616_s1, %s3431_s11  ;;  %p3752_p13 = pneg %p3736_p11 }
  0x19   : > { %p3438_p5 = scmp.lt.u32.totalorder %s3431_s11, %s4616_s1 }
  0x1a   : > { %p3434_p0 = pnand %p3752_p13, %p3432_p12 }
  0x1c   : > { %p3435_p3 = pneg %p3434_p0 }
  0x1e   : > { %p3440_p7 = pnand %p3438_p5, %p3435_p3 }
  0x20   : > { %3443 = shalt.err (!%p3440_p7)
}
  0x21   : > { %s3444_s28 = scalar_lea.vmem %s3729_s29, 128  ;;  %p3452_p1 = scmp.lt.s32.totalorder %s3729_s29, %s3729_s29 }
  0x22   : > { %p3445_p9 = scmp.ne.s32.totalorder %s3729_s29, %s3444_s28  ;;  %p3453_p4 = scmp.lt.s32.totalorder %s3444_s28, %s3444_s28 }
  0x24   : > { %p3447_p10 = pnand %p3445_p9, %p3752_p13  ;;  %p3454_p12 = por %p3453_p4, %p3452_p1 }
  0x26   : > { %p3448_p6 = pneg %p3447_p10 }
  0x28   : > { %p3455_p0 = pnand %p3454_p12, %p3448_p6 }
  0x2a   : > { %3458 = shalt.err (!%p3455_p0)
}
  0x2b   : > { %s3640_s5 = smov 64   ;;  %s3641_s7 = smov 4  }
  0x2c   : > { %3286 = dma.hbm_to_vmem [thread:$0]  (!%p3736_p11), %s4616_s1, 128, %s3729_s29, [#allocation6], %s3640_s5, %s3640_s5, %s3641_s7  }
  0x2d   : > { %s3459_s13 = scalar_lea.hbm %s4617_s2, 16 }
  0x2e   : > { %p3460_p1 = scmp.ne.s32.totalorder %s4617_s2, %s3459_s13  ;;  %p3466_p10 = scmp.lt.u32.totalorder %s3459_s13, %s4617_s2 }
  0x30   : > { %p3462_p4 = pnand %p3460_p1, %p3752_p13 }
  0x32   : > { %p3463_p6 = pneg %p3462_p4 }
  0x34   : > { %p3468_p3 = pnand %p3466_p10, %p3463_p6 }
  0x36   : > { %3471 = shalt.err (!%p3468_p3)
}
  0x37   : > { %s3472_s29 = scalar_lea.vmem %s3740_s6, 16  ;;  %s3479_s9 = scalar_lea.vmem %s3740_s6, 32 }
  0x38   : > { %p3473_p5 = scmp.ne.s32.totalorder %s3740_s6, %s3472_s29  ;;  %p3480_p12 = scmp.lt.s32.totalorder %s3740_s6, %s3740_s6 }
  0x39   : > { %p3481_p0 = scmp.lt.s32.totalorder %s3479_s9, %s3472_s29 }
  0x3a   : > { %p3475_p7 = pnand %p3473_p5, %p3752_p13 }
  0x3b   : > { %p3482_p1 = por %p3481_p0, %p3480_p12 }
  0x3c   : > { %p3476_p9 = pneg %p3475_p7 }
  0x3e   : > { %p3483_p4 = pnand %p3482_p1, %p3476_p9 }
  0x40   : > { %3486 = shalt.err (!%p3483_p4)
}
  0x41   : > { %3289 = dma.hbm_to_vmem [thread:$0]  (!%p3736_p11), %s4617_s2, 16, %s3740_s6, [#allocation6]  }
  0x42   : > { %s3487_s13 = scalar_lea.hbm %s4618_s3, 16 }
  0x43   : > { %p3488_p6 = scmp.ne.s32.totalorder %s4618_s3, %s3487_s13  ;;  %p3494_p5 = scmp.lt.u32.totalorder %s3487_s13, %s4618_s3 }
  0x45   : > { %p3490_p10 = pnand %p3488_p6, %p3752_p13 }
  0x47   : > { %p3491_p3 = pneg %p3490_p10 }
  0x49   : > { %p3496_p7 = pnand %p3494_p5, %p3491_p3 }
  0x4b   : > { %3499 = shalt.err (!%p3496_p7)
}
  0x4c   : > { %s3500_s9 = scalar_lea.vmem %s215_s8, 16  ;;  %s3507_s6 = scalar_lea.vmem %s215_s8, 32 }
  0x4d   : > { %p3501_p9 = scmp.ne.s32.totalorder %s215_s8, %s3500_s9  ;;  %p3508_p1 = scmp.lt.s32.totalorder %s215_s8, %s215_s8 }
  0x4e   : > { %p3509_p4 = scmp.lt.s32.totalorder %s3507_s6, %s3500_s9 }
  0x4f   : > { %p3503_p12 = pnand %p3501_p9, %p3752_p13 }
  0x50   : > { %p3510_p8 = por %p3509_p4, %p3508_p1 }
  0x51   : > { %p3504_p0 = pneg %p3503_p12 }
  0x53   : > { %p3511_p2 = pnand %p3510_p8, %p3504_p0 }
  0x55   : > { %3514 = shalt.err (!%p3511_p2)
}
  0x56   : > { %3292 = dma.hbm_to_vmem [thread:$0]  (!%p3736_p11), %s4618_s3, 16, %s215_s8, [#allocation9]  }
  0x57   : > { %s41_s14 = sadd.s32 1, %s3623_s17  ;;  %s34_s11 = sadd.s32 1, %s3631_s19 }
  0x58   : > { %p48_p2 = scmp.ne.s32.totalorder %s3623_s17, %s3619_s16  ;;  %p36_p8 = scmp.ge.s32.totalorder %s34_s11, 2 }
  0x59   : > { %p49_p13 = scmp.eq.s32.totalorder %s3635_s20, 0  ;;  %p4633_p6 = scmp.ne.s32.totalorder %s4626_s24, 0 }
  0x5a   : > { %p3304_p3 = scmp.lt.s32.totalorder %s3635_s20, 2  ;;  %s4648_s11 = smov (%p36_p8, %s34_s11), 0 }
  0x5b   : > { %p3826_p10 = por %p4633_p6, %p48_p2  ;;  %p50_p5 = por %p49_p13, %p48_p2 }
  0x5c   : > { %s225_s12 = sand.u32 1, %s3623_s17   ;;  %s38_s13 = ssub.s32 %s3631_s19, %s4648_s11 }
  0x5d   : > { %p39_p7 = scmp.eq.s32.totalorder %s38_s13, 0  ;;  %s2667_s8 = sshll.u32 %s225_s12, 9 }
  0x5e   : > { %s2940_s21 = sshll.u32 %s3631_s19, 13  ;;  %s229_s9 = scalar_lea.vmem [#allocation2], %s2667_s8 }
  0x5f   : > { %s3838_s22 = scalar_select %p39_p7, %s3623_s17, %s41_s14  }
  0x60   : > { %s3843_s24 = scalar_lea.hbm %s4615_s0, %s2940_s21  ;;  %s236_s6 = sshll.u32 %s229_s9, 4  ;;  %s3845_s6 = int_to_ptr.vmem [resolvable:$true] %s236_s6 }
  0x61   : > { %p3849_p11 = pnand %p3304_p3, %p50_p5  ;;  %s3853_s10 = scalar_lea.sflag [#allocation3], %s225_s12 }
  0x62   : > { %s3515_s14 = scalar_lea.hbm %s3843_s24, 8192  ;;  %s3520_s21 = scalar_lea.hbm %s4615_s0, 16384 }
  0x63   : > { %p3516_p9 = scmp.ne.s32.totalorder %s3843_s24, %s3515_s14  ;;  %p3517_p12 = pneg %p3849_p11 }
  0x64   : > { %p3521_p4 = scmp.lt.u32.totalorder %s3843_s24, %s4615_s0  ;;  %p3522_p2 = scmp.lt.u32.totalorder %s3520_s21, %s3515_s14 }
  0x65   : > { %p3518_p0 = pnand %p3517_p12, %p3516_p9  ;;  %p3524_p13 = scmp.lt.u32.totalorder %s3515_s14, %s3843_s24 }
  0x66   : > { %p3523_p8 = por %p3522_p2, %p3521_p4 }
  0x67   : > { %p3519_p1 = pneg %p3518_p0 }
  0x68   : > { %p3525_p6 = por %p3524_p13, %p3523_p8 }
  0x6a   : > { %p3526_p3 = pnand %p3525_p6, %p3519_p1 }
  0x6c   : > { %3529 = shalt.err (!%p3526_p3)
}
  0x6d   : > { %s3530_s12 = scalar_lea.vmem %s3845_s6, 8192  ;;  %s3642_s9 = smov [#allocation2]  }
  0x6e   : > { %p3531_p5 = scmp.ne.s32.totalorder %s3845_s6, %s3530_s12  ;;  %s3535_s13 = sshll.u32 %s3642_s9, 4  ;;  %s3536_s13 = int_to_ptr.vmem [resolvable:$false] %s3535_s13 }
  0x6f   : > { %s3537_s8 = scalar_lea.vmem %s3536_s13, 16384  ;;  %p3538_p0 = scmp.lt.s32.totalorder %s3845_s6, %s3536_s13 }
  0x70   : > { %p3533_p7 = pnand %p3531_p5, %p3517_p12  ;;  %p3539_p4 = scmp.lt.s32.totalorder %s3537_s8, %s3530_s12 }
  0x72   : > { %p3534_p9 = pneg %p3533_p7  ;;  %p3540_p2 = por %p3539_p4, %p3538_p0 }
  0x74   : > { %p3541_p8 = pnand %p3540_p2, %p3534_p9 }
  0x76   : > { %3544 = shalt.err (!%p3541_p8)
}
  0x77   : > { %3296 = dma.hbm_to_vmem [thread:$0]  (!%p3849_p11), %s3843_s24, 8192, %s3845_s6, %s3853_s10, %s3640_s5, %s3640_s5, %s3641_s7  }
  0x78   : > { %p4636_p12 = scmp.ne.s32.totalorder %s4630_s27, 0 }
  0x79   : > { %s3887_s14 = sand.u32 (!%p4636_p12), 1, %s3619_s16   ;;  %p4637_p1 = scmp.ne.s32.totalorder (!%p4636_p12), %s4627_s25, 0 }
  0x7a   : > { %248 = sbr.rel (%p4636_p12) target bundleno = 513 (0x201), region = 36  ;;  %s2671_s21 = sshll.u32 (!%p4636_p12), %s3887_s14, 9 }
  0x7b   : > { %s251_s28 = scalar_lea.sflag (!%p4636_p12), [#allocation3], %s3887_s14  ;;  %s3893_s26 = scalar_lea.vmem (!%p4636_p12), [#allocation2], %s2671_s21 }
  0x81   : > { %3598 = dma.done.wait (%p4637_p1), %s251_s28, 8192  }
  0x82   : > { %3600 = vsyncadd (%p4637_p1), %s251_s28, 4294959104  ;;  %p4638_p11 = scmp.ne.s32.totalorder %s4625_s23, 0 }
  0x84   : > { %3602 = dma.done.wait (%p4638_p11), [#allocation6], 144  }
  0x85   : > { %3604 = vsyncadd (%p4638_p11), [#allocation6], 4294967152 }
  0x86   : > { %3606 = dma.done.wait (%p4638_p11), [#allocation9], 16  }
  0x87   : > { %3608 = vsyncadd (%p4638_p11), [#allocation9], 4294967280  ;;  %v3364_v0 = vld [vmem:[#allocation5] sm:$0xff]   ;;  %vm750_vm0 = vcmask 130048   ;;  %v3367_v3 = vld [vmem:[%s3893_s26 + $0x8] sm:$0xff]   ;;  %vm2398_vm1 = vcmask 519168  }
  0x88   : > { %v3365_v1 = vld [vmem:[%s3893_s26] sm:$0xff]   ;;  %3135 = vmatprep.subr.bf16.mxu0 %v3364_v0  ;;  %3265 = vmatprep.subr.bf16.mxu1 %v3364_v0  ;;  %v3368_v4 = vld [vmem:[%s3893_s26 + $0x108] sm:$0xff]   ;;  %v3369_v5 = vld [vmem:[%s3893_s26 + $0x10] sm:$0xff]   ;;  %s4057_s23 = scalar_lea.vmem [#allocation10], %s2671_s21  ;;  %s3069_s25 = sshll.u32 %s3627_s18, 13 }
  0x89   : > { %v3366_v2 = vld [vmem:[%s3893_s26 + $0x100] sm:$0xff]   ;;  %3136 = vmatpush3.bf16.msra.mxu0 %v3364_v0  ;;  %3266 = vmatpush3.bf16.msra.mxu1 %v3364_v0  ;;  %v3370_v6 = vld [vmem:[%s3893_s26 + $0x110] sm:$0xff]   ;;  %v3371_v7 = vld [vmem:[%s3893_s26 + $0x18] sm:$0xff]   ;;  %s2542_s27 = sshll.u32 %s4057_s23, 4  ;;  %s4552_s7 = scalar_lea.hbm %s4619_s4, %s3069_s25  ;;  %s4554_s27 = int_to_ptr.vmem [resolvable:$true] %s2542_s27 }
  0x8a   : > { %3137 = vmatprep.mubr.msk.bf16.mxu0 %vm750_vm0, %v3365_v1  ;;  %3201 = vmatprep.mubr.msk.bf16.mxu1 %vm750_vm0, %v3366_v2  ;;  %v3372_v8 = vld [vmem:[%s3893_s26 + $0x118] sm:$0xff]   ;;  %v3373_v9 = vld [vmem:[%s3893_s26 + $0x20] sm:$0xff]   ;;  %v3375_v11 = vld [vmem:[%s3893_s26 + $0x28] sm:$0xff]   ;;  %s2528_s24 = scalar_lea.sflag [#allocation4], %s3887_s14  ;;  %s3545_s6 = scalar_lea.vmem %s4554_s27, 8192 }
  0x8b   : > { %v3374_v10 = vld [vmem:[%s3893_s26 + $0x120] sm:$0xff]   ;;  %v3376_v12 = vld [vmem:[%s3893_s26 + $0x128] sm:$0xff]   ;;  %v3377_v13 = vld [vmem:[%s3893_s26 + $0x30] sm:$0xff]   ;;  %p3546_p13 = scmp.ne.s32.totalorder %s4554_s27, %s3545_s6  ;;  %s3643_s10 = smov [#allocation10]  }
  0x8c   : > { %3138 = vmatmul.mubr.msk.bf16.vlgmr.msra.gmra.mrb[0].mxu0 %vm750_vm0, %v3367_v3  ;;  %3202 = vmatmul.mubr.msk.bf16.vlgmr.msra.gmra.mrb[0].mxu1 %vm750_vm0, %v3368_v4  ;;  %v3378_v14 = vld [vmem:[%s3893_s26 + $0x130] sm:$0xff]   ;;  %v3379_v15 = vld [vmem:[%s3893_s26 + $0x38] sm:$0xff]   ;;  %v3381_v17 = vld [vmem:[%s3893_s26 + $0x40] sm:$0xff]   ;;  %s3549_s29 = sshll.u32 %s3643_s10, 4  ;;  %s3550_s29 = int_to_ptr.vmem [resolvable:$false] %s3549_s29 }
  0x8d   : > { %3141 = vmatprep.mubr.msk.bf16.mxu0 %vm750_vm0, %v3369_v5  ;;  %3205 = vmatprep.mubr.msk.bf16.mxu1 %vm750_vm0, %v3370_v6  ;;  %v3380_v16 = vld [vmem:[%s3893_s26 + $0x138] sm:$0xff]   ;;  %v3382_v18 = vld [vmem:[%s3893_s26 + $0x140] sm:$0xff]   ;;  %v3383_v19 = vld [vmem:[%s3893_s26 + $0x48] sm:$0xff]   ;;  %p3547_p6 = pnand %p3546_p13, %p3826_p10  ;;  %s3551_s12 = scalar_lea.vmem %s3550_s29, 16384 }
  0x8e   : > { %v3384_v20 = vld [vmem:[%s3893_s26 + $0x148] sm:$0xff]   ;;  %v3385_v21 = vld [vmem:[%s3893_s26 + $0x50] sm:$0xff]   ;;  %v3387_v23 = vld [vmem:[%s3893_s26 + $0x58] sm:$0xff]   ;;  %p3552_p5 = scmp.lt.s32.totalorder %s4554_s27, %s3550_s29  ;;  %p3553_p7 = scmp.lt.s32.totalorder %s3551_s12, %s3545_s6 }
  0x8f   : > { %v3386_v22 = vld [vmem:[%s3893_s26 + $0x150] sm:$0xff]   ;;  %v3388_v24 = vld [vmem:[%s3893_s26 + $0x158] sm:$0xff]   ;;  %v3389_v25 = vld [vmem:[%s3893_s26 + $0x60] sm:$0xff]   ;;  %p3548_p3 = pneg %p3547_p6 }
  0x90   : > { %v3390_v26 = vld [vmem:[%s3893_s26 + $0x160] sm:$0xff]   ;;  %v3391_v27 = vld [vmem:[%s3893_s26 + $0x68] sm:$0xff]   ;;  %v3393_v29 = vld [vmem:[%s3893_s26 + $0x70] sm:$0xff]   ;;  %p3554_p9 = por %p3553_p7, %p3552_p5 }
  0x91   : > { %v3392_v28 = vld [vmem:[%s3893_s26 + $0x168] sm:$0xff]   ;;  %v3394_v30 = vld [vmem:[%s3893_s26 + $0x170] sm:$0xff]   ;;  %v3395_v31 = vld [vmem:[%s3893_s26 + $0x78] sm:$0xff]  }
  0x92   : > { %v3396_v32 = vld [vmem:[%s3893_s26 + $0x178] sm:$0xff]   ;;  %v3397_v33 = vld [vmem:[%s3893_s26 + $0x80] sm:$0xff]   ;;  %v3399_v35 = vld [vmem:[%s3893_s26 + $0x88] sm:$0xff]   ;;  %p3555_p0 = pnand %p3554_p9, %p3548_p3 }
  0x93   : > { %v3398_v34 = vld [vmem:[%s3893_s26 + $0x180] sm:$0xff]   ;;  %v3400_v36 = vld [vmem:[%s3893_s26 + $0x188] sm:$0xff]   ;;  %v3401_v37 = vld [vmem:[%s3893_s26 + $0x90] sm:$0xff]  }
  0x94   : > { %3142 = vmatmul.mubr.msk.bf16.gmra.mrb[4].mxu0 %vm750_vm0, %v3371_v7  ;;  %3206 = vmatmul.mubr.msk.bf16.gmra.mrb[4].mxu1 %vm750_vm0, %v3372_v8  ;;  %v3402_v38 = vld [vmem:[%s3893_s26 + $0x190] sm:$0xff]   ;;  %v3403_v39 = vld [vmem:[%s3893_s26 + $0x98] sm:$0xff]   ;;  %v3405_v41 = vld [vmem:[%s3893_s26 + $0xa0] sm:$0xff]  }
  0x95   : > { %3145 = vmatprep.mubr.msk.bf16.mxu0 %vm750_vm0, %v3373_v9  ;;  %3209 = vmatprep.mubr.msk.bf16.mxu1 %vm750_vm0, %v3374_v10  ;;  %v3404_v40 = vld [vmem:[%s3893_s26 + $0x198] sm:$0xff]   ;;  %v3406_v42 = vld [vmem:[%s3893_s26 + $0x1a0] sm:$0xff]   ;;  %v3407_v43 = vld [vmem:[%s3893_s26 + $0xa8] sm:$0xff]  }
  0x96   : > { %v3408_v44 = vld [vmem:[%s3893_s26 + $0x1a8] sm:$0xff]   ;;  %v3409_v45 = vld [vmem:[%s3893_s26 + $0xb0] sm:$0xff]   ;;  %v3411_v47 = vld [vmem:[%s3893_s26 + $0xb8] sm:$0xff]  }
  0x97   : > { %v3410_v46 = vld [vmem:[%s3893_s26 + $0x1b0] sm:$0xff]   ;;  %v3412_v48 = vld [vmem:[%s3893_s26 + $0x1b8] sm:$0xff]   ;;  %v3413_v49 = vld [vmem:[%s3893_s26 + $0xc0] sm:$0xff]  }
  0x98   : > { %v3414_v50 = vld [vmem:[%s3893_s26 + $0x1c0] sm:$0xff]   ;;  %v3415_v51 = vld [vmem:[%s3893_s26 + $0xc8] sm:$0xff]   ;;  %v3417_v53 = vld [vmem:[%s3893_s26 + $0xd0] sm:$0xff]  }
  0x99   : > { %v3416_v52 = vld [vmem:[%s3893_s26 + $0x1c8] sm:$0xff]   ;;  %v3418_v54 = vld [vmem:[%s3893_s26 + $0x1d0] sm:$0xff]   ;;  %v3419_v55 = vld [vmem:[%s3893_s26 + $0xd8] sm:$0xff]  }
  0x9a   : > { %v3420_v56 = vld [vmem:[%s3893_s26 + $0x1d8] sm:$0xff]   ;;  %v3421_v57 = vld [vmem:[%s3893_s26 + $0xe0] sm:$0xff]   ;;  %v3423_v59 = vld [vmem:[%s3893_s26 + $0xe8] sm:$0xff]  }
  0x9b   : > { %v3422_v58 = vld [vmem:[%s3893_s26 + $0x1e0] sm:$0xff]   ;;  %v3424_v60 = vld [vmem:[%s3893_s26 + $0x1e8] sm:$0xff]   ;;  %v3425_v61 = vld [vmem:[%s3893_s26 + $0xf0] sm:$0xff]  }
  0x9c   : > { %3146 = vmatmul.mubr.msk.bf16.gmra.mrb[8].mxu0 %vm750_vm0, %v3375_v11  ;;  %3210 = vmatmul.mubr.msk.bf16.gmra.mrb[8].mxu1 %vm750_vm0, %v3376_v12  ;;  %v3426_v62 = vld [vmem:[%s3893_s26 + $0x1f0] sm:$0xff]   ;;  %v3427_v63 = vld [vmem:[%s3893_s26 + $0xf8] sm:$0xff]   ;;  %v4035_v1 = vld [vmem:[#allocation7] ss:$0 sm:$0xff] }
  0x9d   : > { %3149 = vmatprep.mubr.msk.bf16.mxu0 %vm750_vm0, %v3377_v13  ;;  %3213 = vmatprep.mubr.msk.bf16.mxu1 %vm750_vm0, %v3378_v14  ;;  %v3428_v0 = vld [vmem:[%s3893_s26 + $0x1f8] sm:$0xff]   ;;  %v4037_v3 = vld [vmem:[#allocation8] ss:$0 sm:$0xff] }
  0xa4   : > { %3150 = vmatmul.mubr.msk.bf16.gmra.mrb[12].mxu0 %vm750_vm0, %v3379_v15  ;;  %3214 = vmatmul.mubr.msk.bf16.gmra.mrb[12].mxu1 %vm750_vm0, %v3380_v16 }
  0xa5   : > { %3153 = vmatprep.mubr.msk.bf16.mxu0 %vm750_vm0, %v3381_v17  ;;  %3217 = vmatprep.mubr.msk.bf16.mxu1 %vm750_vm0, %v3382_v18 }
  0xac   : > { %3154 = vmatmul.mubr.msk.bf16.gmra.mrb[16].mxu0 %vm750_vm0, %v3383_v19  ;;  %3218 = vmatmul.mubr.msk.bf16.gmra.mrb[16].mxu1 %vm750_vm0, %v3384_v20 }
  0xad   : > { %3157 = vmatprep.mubr.msk.bf16.mxu0 %vm750_vm0, %v3385_v21  ;;  %3221 = vmatprep.mubr.msk.bf16.mxu1 %vm750_vm0, %v3386_v22 }
  0xb4   : > { %3158 = vmatmul.mubr.msk.bf16.gmra.mrb[20].mxu0 %vm750_vm0, %v3387_v23  ;;  %3222 = vmatmul.mubr.msk.bf16.gmra.mrb[20].mxu1 %vm750_vm0, %v3388_v24 }
  0xb5   : > { %3161 = vmatprep.mubr.msk.bf16.mxu0 %vm750_vm0, %v3389_v25  ;;  %3225 = vmatprep.mubr.msk.bf16.mxu1 %vm750_vm0, %v3390_v26 }
  0xbc   : > { %3162 = vmatmul.mubr.msk.bf16.gmra.mrb[24].mxu0 %vm750_vm0, %v3391_v27  ;;  %3226 = vmatmul.mubr.msk.bf16.gmra.mrb[24].mxu1 %vm750_vm0, %v3392_v28 }
  0xbd   : > { %3165 = vmatprep.mubr.msk.bf16.mxu0 %vm750_vm0, %v3393_v29  ;;  %3229 = vmatprep.mubr.msk.bf16.mxu1 %vm750_vm0, %v3394_v30 }
  0xc4   : > { %3166 = vmatmul.mubr.msk.bf16.gmra.mrb[28].mxu0 %vm750_vm0, %v3395_v31  ;;  %3230 = vmatmul.mubr.msk.bf16.gmra.mrb[28].mxu1 %vm750_vm0, %v3396_v32 }
  0xc5   : > { %3169 = vmatprep.mubr.msk.bf16.mxu0 %vm750_vm0, %v3397_v33  ;;  %3233 = vmatprep.mubr.msk.bf16.mxu1 %vm750_vm0, %v3398_v34 }
  0xcc   : > { %3170 = vmatmul.mubr.msk.bf16.gmra.mrb[32].mxu0 %vm750_vm0, %v3399_v35  ;;  %3234 = vmatmul.mubr.msk.bf16.gmra.mrb[32].mxu1 %vm750_vm0, %v3400_v36 }
  0xcd   : > { %3173 = vmatprep.mubr.msk.bf16.mxu0 %vm750_vm0, %v3401_v37  ;;  %3237 = vmatprep.mubr.msk.bf16.mxu1 %vm750_vm0, %v3402_v38 }
  0xd4   : > { %3174 = vmatmul.mubr.msk.bf16.gmra.mrb[36].mxu0 %vm750_vm0, %v3403_v39  ;;  %3238 = vmatmul.mubr.msk.bf16.gmra.mrb[36].mxu1 %vm750_vm0, %v3404_v40 }
  0xd5   : > { %3177 = vmatprep.mubr.msk.bf16.mxu0 %vm750_vm0, %v3405_v41  ;;  %3241 = vmatprep.mubr.msk.bf16.mxu1 %vm750_vm0, %v3406_v42 }
  0xdc   : > { %3178 = vmatmul.mubr.msk.bf16.gmra.mrb[40].mxu0 %vm750_vm0, %v3407_v43  ;;  %3242 = vmatmul.mubr.msk.bf16.gmra.mrb[40].mxu1 %vm750_vm0, %v3408_v44 }
  0xdd   : > { %3181 = vmatprep.mubr.msk.bf16.mxu0 %vm750_vm0, %v3409_v45  ;;  %3245 = vmatprep.mubr.msk.bf16.mxu1 %vm750_vm0, %v3410_v46 }
  0xe4   : > { %3182 = vmatmul.mubr.msk.bf16.gmra.mrb[44].mxu0 %vm750_vm0, %v3411_v47  ;;  %3246 = vmatmul.mubr.msk.bf16.gmra.mrb[44].mxu1 %vm750_vm0, %v3412_v48 }
  0xe5   : > { %3185 = vmatprep.mubr.msk.bf16.mxu0 %vm750_vm0, %v3413_v49  ;;  %3249 = vmatprep.mubr.msk.bf16.mxu1 %vm750_vm0, %v3414_v50 }
  0xec   : > { %3186 = vmatmul.mubr.msk.bf16.gmra.mrb[48].mxu0 %vm750_vm0, %v3415_v51  ;;  %3250 = vmatmul.mubr.msk.bf16.gmra.mrb[48].mxu1 %vm750_vm0, %v3416_v52 }
  0xed   : > { %3189 = vmatprep.mubr.msk.bf16.mxu0 %vm750_vm0, %v3417_v53  ;;  %3253 = vmatprep.mubr.msk.bf16.mxu1 %vm750_vm0, %v3418_v54 }
  0xf4   : > { %3190 = vmatmul.mubr.msk.bf16.gmra.mrb[52].mxu0 %vm750_vm0, %v3419_v55  ;;  %3254 = vmatmul.mubr.msk.bf16.gmra.mrb[52].mxu1 %vm750_vm0, %v3420_v56 }
  0xf5   : > { %3193 = vmatprep.mubr.msk.bf16.mxu0 %vm750_vm0, %v3421_v57  ;;  %3257 = vmatprep.mubr.msk.bf16.mxu1 %vm750_vm0, %v3422_v58 }
  0xfc   : > { %3194 = vmatmul.mubr.msk.bf16.gmra.mrb[56].mxu0 %vm750_vm0, %v3423_v59  ;;  %3258 = vmatmul.mubr.msk.bf16.gmra.mrb[56].mxu1 %vm750_vm0, %v3424_v60 }
  0xfd   : > { %3197 = vmatprep.mubr.msk.bf16.mxu0 %vm750_vm0, %v3425_v61  ;;  %3261 = vmatprep.mubr.msk.bf16.mxu1 %vm750_vm0, %v3426_v62 }
 0x104   : > { %3198 = vmatmul.mubr.msk.bf16.gmra.mrb[60].mxu0 %vm750_vm0, %v3427_v63  ;;  %3262 = vmatmul.mubr.msk.bf16.gmra.mrb[60].mxu1 %vm750_vm0, %v3428_v0 }
 0x15f   : > { %v3139_v2 = vpop.f32.mrb[0].mxu0  ;;  %v3203_v4 = vpop.f32.mrb[0].mxu1 }
 0x160   : > { %v1497_v5 = vmul.f32 %v3139_v2, %v4035_v1  ;;  %v1561_v6 = vmul.f32 %v3203_v4, %v4035_v1  ;;  %v977_v7 = vpop.f32.mrb[1].mxu0  ;;  %v1233_v8 = vpop.f32.mrb[1].mxu1 }
 0x161   : > { %v1495_v9 = vmul.f32 %v4035_v1, %v977_v7  ;;  %v1559_v10 = vmul.f32 %v4035_v1, %v1233_v8  ;;  %v3140_v11 = vpop.f32.mrb[2].mxu0  ;;  %v3204_v12 = vpop.f32.mrb[2].mxu1 }
 0x162   : > { %v1632_v13 = vadd.f32 %v4037_v3, %v1497_v5  ;;  %v1696_v14 = vadd.f32 %v4037_v3, %v1561_v6  ;;  %v1498_v15 = vmul.f32 %v3140_v11, %v4035_v1  ;;  %v1562_v16 = vmul.f32 %v3204_v12, %v4035_v1  ;;  %v980_v17 = vpop.f32.mrb[3].mxu0  ;;  %v1236_v18 = vpop.f32.mrb[3].mxu1 }
 0x163   : > { %v1630_v19 = vadd.f32 %v4037_v3, %v1495_v9  ;;  %v1694_v20 = vadd.f32 %v4037_v3, %v1559_v10  ;;  %v1496_v21 = vmul.f32 %v4035_v1, %v980_v17  ;;  %v1560_v22 = vmul.f32 %v4035_v1, %v1236_v18 }
 0x164   : > { %v1760_v23 = vmax.f32 %v1632_v13, 0.0  ;;  %v1824_v24 = vmax.f32 %v1696_v14, 0.0  ;;  %v1633_v25 = vadd.f32 %v4037_v3, %v1498_v15  ;;  %v1697_v26 = vadd.f32 %v4037_v3, %v1562_v16 }
 0x165   : > { %v1758_v27 = vmax.f32 %v1630_v19, 0.0  ;;  %v1822_v28 = vmax.f32 %v1694_v20, 0.0  ;;  %v1631_v29 = vadd.f32 %v4037_v3, %v1496_v21  ;;  %v1695_v30 = vadd.f32 %v4037_v3, %v1560_v22 }
 0x166   : > { %v2943_v31 = vpack.c.bf16 %v1760_v23, %v1760_v23  ;;  %v3007_v32 = vpack.c.bf16 %v1824_v24, %v1824_v24  ;;  %v1761_v33 = vmax.f32 %v1633_v25, 0.0  ;;  %v1825_v34 = vmax.f32 %v1697_v26, 0.0 }
 0x167   : > { %v2941_v35 = vpack.c.bf16 %v1758_v27, %v1758_v27  ;;  %v3005_v36 = vpack.c.bf16 %v1822_v28, %v1822_v28  ;;  %v1759_v37 = vmax.f32 %v1631_v29, 0.0  ;;  %v1823_v38 = vmax.f32 %v1695_v30, 0.0  ;;  %v3143_v39 = vpop.f32.mrb[4].mxu0  ;;  %v3207_v40 = vpop.f32.mrb[4].mxu1 }
 0x168   : > { %2401 = vst.msk [vmem:[%s4057_s23 + $0x8] sm:$0xf] %vm2398_vm1, %v2943_v31  ;;  %2465 = vst.msk [vmem:[%s4057_s23 + $0x108] sm:$0xf] %vm2398_vm1, %v3007_v32  ;;  %v2944_v41 = vpack.c.bf16 %v1761_v33, %v1761_v33  ;;  %v3008_v42 = vpack.c.bf16 %v1825_v34, %v1825_v34  ;;  %v1501_v43 = vmul.f32 %v3143_v39, %v4035_v1  ;;  %v993_v45 = vpop.f32.mrb[5].mxu0  ;;  %v1249_v46 = vpop.f32.mrb[5].mxu1 }
 0x169   : > { %v1565_v44 = vmul.f32 %v3207_v40, %v4035_v1  ;;  %2399 = vst.msk [vmem:[%s4057_s23] sm:$0xf] %vm2398_vm1, %v2941_v35  ;;  %2463 = vst.msk [vmem:[%s4057_s23 + $0x100] sm:$0xf] %vm2398_vm1, %v3005_v36  ;;  %v2942_v47 = vpack.c.bf16 %v1759_v37, %v1759_v37  ;;  %v3006_v48 = vpack.c.bf16 %v1823_v38, %v1823_v38  ;;  %v3144_v51 = vpop.f32.mrb[6].mxu0  ;;  %v3208_v52 = vpop.f32.mrb[6].mxu1 }
 0x16a   : > { %v1499_v49 = vmul.f32 %v4035_v1, %v993_v45  ;;  %v1563_v50 = vmul.f32 %v4035_v1, %v1249_v46  ;;  %2402 = vst.msk [vmem:[%s4057_s23 + $0xc] sm:$0xf] %vm2398_vm1, %v2944_v41  ;;  %2466 = vst.msk [vmem:[%s4057_s23 + $0x10c] sm:$0xf] %vm2398_vm1, %v3008_v42  ;;  %v1636_v53 = vadd.f32 %v4037_v3, %v1501_v43  ;;  %v996_v57 = vpop.f32.mrb[7].mxu0  ;;  %v1252_v58 = vpop.f32.mrb[7].mxu1 }
 0x16b   : > { %v1700_v54 = vadd.f32 %v4037_v3, %v1565_v44  ;;  %v1502_v55 = vmul.f32 %v3144_v51, %v4035_v1  ;;  %v1566_v56 = vmul.f32 %v3208_v52, %v4035_v1  ;;  %2400 = vst.msk [vmem:[%s4057_s23 + $0x4] sm:$0xf] %vm2398_vm1, %v2942_v47  ;;  %2464 = vst.msk [vmem:[%s4057_s23 + $0x104] sm:$0xf] %vm2398_vm1, %v3006_v48 }
 0x16c   : > { %v1634_v59 = vadd.f32 %v4037_v3, %v1499_v49  ;;  %v1698_v60 = vadd.f32 %v4037_v3, %v1563_v50  ;;  %v1500_v61 = vmul.f32 %v4035_v1, %v996_v57  ;;  %v1564_v62 = vmul.f32 %v4035_v1, %v1252_v58 }
 0x16d   : > { %v1764_v63 = vmax.f32 %v1636_v53, 0.0  ;;  %v1828_v0 = vmax.f32 %v1700_v54, 0.0  ;;  %v1637_v2 = vadd.f32 %v4037_v3, %v1502_v55  ;;  %v1701_v4 = vadd.f32 %v4037_v3, %v1566_v56 }
 0x16e   : > { %v1762_v5 = vmax.f32 %v1634_v59, 0.0  ;;  %v1826_v6 = vmax.f32 %v1698_v60, 0.0  ;;  %v1635_v7 = vadd.f32 %v4037_v3, %v1500_v61  ;;  %v1699_v8 = vadd.f32 %v4037_v3, %v1564_v62 }
 0x16f   : > { %v2947_v9 = vpack.c.bf16 %v1764_v63, %v1764_v63  ;;  %v3011_v10 = vpack.c.bf16 %v1828_v0, %v1828_v0  ;;  %v1765_v11 = vmax.f32 %v1637_v2, 0.0  ;;  %v1829_v12 = vmax.f32 %v1701_v4, 0.0  ;;  %v3147_v17 = vpop.f32.mrb[8].mxu0  ;;  %v3211_v18 = vpop.f32.mrb[8].mxu1 }
 0x170   : > { %v2945_v13 = vpack.c.bf16 %v1762_v5, %v1762_v5  ;;  %v3009_v14 = vpack.c.bf16 %v1826_v6, %v1826_v6  ;;  %v1763_v15 = vmax.f32 %v1635_v7, 0.0  ;;  %v1827_v16 = vmax.f32 %v1699_v8, 0.0  ;;  %v1009_v23 = vpop.f32.mrb[9].mxu0  ;;  %v1265_v24 = vpop.f32.mrb[9].mxu1 }
 0x171   : > { %2405 = vst.msk [vmem:[%s4057_s23 + $0x18] sm:$0xf] %vm2398_vm1, %v2947_v9  ;;  %2469 = vst.msk [vmem:[%s4057_s23 + $0x118] sm:$0xf] %vm2398_vm1, %v3011_v10  ;;  %v2948_v19 = vpack.c.bf16 %v1765_v11, %v1765_v11  ;;  %v3012_v20 = vpack.c.bf16 %v1829_v12, %v1829_v12  ;;  %v1505_v21 = vmul.f32 %v3147_v17, %v4035_v1  ;;  %v3148_v29 = vpop.f32.mrb[10].mxu0  ;;  %v3212_v30 = vpop.f32.mrb[10].mxu1 }
 0x172   : > { %v1569_v22 = vmul.f32 %v3211_v18, %v4035_v1  ;;  %2403 = vst.msk [vmem:[%s4057_s23 + $0x10] sm:$0xf] %vm2398_vm1, %v2945_v13  ;;  %2467 = vst.msk [vmem:[%s4057_s23 + $0x110] sm:$0xf] %vm2398_vm1, %v3009_v14  ;;  %v2946_v25 = vpack.c.bf16 %v1763_v15, %v1763_v15  ;;  %v3010_v26 = vpack.c.bf16 %v1827_v16, %v1827_v16  ;;  %v1012_v35 = vpop.f32.mrb[11].mxu0  ;;  %v1268_v36 = vpop.f32.mrb[11].mxu1 }
 0x173   : > { %v1503_v27 = vmul.f32 %v4035_v1, %v1009_v23  ;;  %v1567_v28 = vmul.f32 %v4035_v1, %v1265_v24  ;;  %2406 = vst.msk [vmem:[%s4057_s23 + $0x1c] sm:$0xf] %vm2398_vm1, %v2948_v19  ;;  %2470 = vst.msk [vmem:[%s4057_s23 + $0x11c] sm:$0xf] %vm2398_vm1, %v3012_v20  ;;  %v1640_v31 = vadd.f32 %v4037_v3, %v1505_v21 }
 0x174   : > { %v1704_v32 = vadd.f32 %v4037_v3, %v1569_v22  ;;  %v1506_v33 = vmul.f32 %v3148_v29, %v4035_v1  ;;  %v1570_v34 = vmul.f32 %v3212_v30, %v4035_v1  ;;  %2404 = vst.msk [vmem:[%s4057_s23 + $0x14] sm:$0xf] %vm2398_vm1, %v2946_v25  ;;  %2468 = vst.msk [vmem:[%s4057_s23 + $0x114] sm:$0xf] %vm2398_vm1, %v3010_v26 }
 0x175   : > { %v1638_v37 = vadd.f32 %v4037_v3, %v1503_v27  ;;  %v1702_v38 = vadd.f32 %v4037_v3, %v1567_v28  ;;  %v1504_v39 = vmul.f32 %v4035_v1, %v1012_v35  ;;  %v1568_v40 = vmul.f32 %v4035_v1, %v1268_v36 }
 0x176   : > { %v1768_v41 = vmax.f32 %v1640_v31, 0.0  ;;  %v1832_v42 = vmax.f32 %v1704_v32, 0.0  ;;  %v1641_v43 = vadd.f32 %v4037_v3, %v1506_v33  ;;  %v1705_v44 = vadd.f32 %v4037_v3, %v1570_v34 }
 0x177   : > { %v1766_v45 = vmax.f32 %v1638_v37, 0.0  ;;  %v1830_v46 = vmax.f32 %v1702_v38, 0.0  ;;  %v1639_v47 = vadd.f32 %v4037_v3, %v1504_v39  ;;  %v1703_v48 = vadd.f32 %v4037_v3, %v1568_v40  ;;  %v3151_v57 = vpop.f32.mrb[12].mxu0  ;;  %v3215_v58 = vpop.f32.mrb[12].mxu1 }
 0x178   : > { %v2951_v49 = vpack.c.bf16 %v1768_v41, %v1768_v41  ;;  %v3015_v50 = vpack.c.bf16 %v1832_v42, %v1832_v42  ;;  %v1769_v51 = vmax.f32 %v1641_v43, 0.0  ;;  %v1833_v52 = vmax.f32 %v1705_v44, 0.0  ;;  %v1025_v63 = vpop.f32.mrb[13].mxu0  ;;  %v1281_v0 = vpop.f32.mrb[13].mxu1 }
 0x179   : > { %v2949_v53 = vpack.c.bf16 %v1766_v45, %v1766_v45  ;;  %v3013_v54 = vpack.c.bf16 %v1830_v46, %v1830_v46  ;;  %v1767_v55 = vmax.f32 %v1639_v47, 0.0  ;;  %v1831_v56 = vmax.f32 %v1703_v48, 0.0  ;;  %v3152_v7 = vpop.f32.mrb[14].mxu0  ;;  %v3216_v8 = vpop.f32.mrb[14].mxu1 }
 0x17a   : > { %2409 = vst.msk [vmem:[%s4057_s23 + $0x28] sm:$0xf] %vm2398_vm1, %v2951_v49  ;;  %2473 = vst.msk [vmem:[%s4057_s23 + $0x128] sm:$0xf] %vm2398_vm1, %v3015_v50  ;;  %v2952_v59 = vpack.c.bf16 %v1769_v51, %v1769_v51  ;;  %v3016_v60 = vpack.c.bf16 %v1833_v52, %v1833_v52  ;;  %v1509_v61 = vmul.f32 %v3151_v57, %v4035_v1  ;;  %v1028_v13 = vpop.f32.mrb[15].mxu0  ;;  %v1284_v14 = vpop.f32.mrb[15].mxu1 }
 0x17b   : > { %v1573_v62 = vmul.f32 %v3215_v58, %v4035_v1  ;;  %2407 = vst.msk [vmem:[%s4057_s23 + $0x20] sm:$0xf] %vm2398_vm1, %v2949_v53  ;;  %2471 = vst.msk [vmem:[%s4057_s23 + $0x120] sm:$0xf] %vm2398_vm1, %v3013_v54  ;;  %v2950_v2 = vpack.c.bf16 %v1767_v55, %v1767_v55  ;;  %v3014_v4 = vpack.c.bf16 %v1831_v56, %v1831_v56 }
 0x17c   : > { %v1507_v5 = vmul.f32 %v4035_v1, %v1025_v63  ;;  %v1571_v6 = vmul.f32 %v4035_v1, %v1281_v0  ;;  %2410 = vst.msk [vmem:[%s4057_s23 + $0x2c] sm:$0xf] %vm2398_vm1, %v2952_v59  ;;  %2474 = vst.msk [vmem:[%s4057_s23 + $0x12c] sm:$0xf] %vm2398_vm1, %v3016_v60  ;;  %v1644_v9 = vadd.f32 %v4037_v3, %v1509_v61 }
 0x17d   : > { %v1708_v10 = vadd.f32 %v4037_v3, %v1573_v62  ;;  %v1510_v11 = vmul.f32 %v3152_v7, %v4035_v1  ;;  %v1574_v12 = vmul.f32 %v3216_v8, %v4035_v1  ;;  %2408 = vst.msk [vmem:[%s4057_s23 + $0x24] sm:$0xf] %vm2398_vm1, %v2950_v2  ;;  %2472 = vst.msk [vmem:[%s4057_s23 + $0x124] sm:$0xf] %vm2398_vm1, %v3014_v4 }
 0x17e   : > { %v1642_v15 = vadd.f32 %v4037_v3, %v1507_v5  ;;  %v1706_v16 = vadd.f32 %v4037_v3, %v1571_v6  ;;  %v1508_v17 = vmul.f32 %v4035_v1, %v1028_v13  ;;  %v1572_v18 = vmul.f32 %v4035_v1, %v1284_v14 }
 0x17f   : > { %v1772_v19 = vmax.f32 %v1644_v9, 0.0  ;;  %v1836_v20 = vmax.f32 %v1708_v10, 0.0  ;;  %v1645_v21 = vadd.f32 %v4037_v3, %v1510_v11  ;;  %v1709_v22 = vadd.f32 %v4037_v3, %v1574_v12  ;;  %v3155_v35 = vpop.f32.mrb[16].mxu0  ;;  %v3219_v36 = vpop.f32.mrb[16].mxu1 }
 0x180   : > { %v1770_v23 = vmax.f32 %v1642_v15, 0.0  ;;  %v1834_v24 = vmax.f32 %v1706_v16, 0.0  ;;  %v1643_v25 = vadd.f32 %v4037_v3, %v1508_v17  ;;  %v1707_v26 = vadd.f32 %v4037_v3, %v1572_v18  ;;  %v1041_v41 = vpop.f32.mrb[17].mxu0  ;;  %v1297_v42 = vpop.f32.mrb[17].mxu1 }
 0x181   : > { %v2955_v27 = vpack.c.bf16 %v1772_v19, %v1772_v19  ;;  %v3019_v28 = vpack.c.bf16 %v1836_v20, %v1836_v20  ;;  %v1773_v29 = vmax.f32 %v1645_v21, 0.0  ;;  %v1837_v30 = vmax.f32 %v1709_v22, 0.0  ;;  %v3156_v47 = vpop.f32.mrb[18].mxu0  ;;  %v3220_v48 = vpop.f32.mrb[18].mxu1 }
 0x182   : > { %v2953_v31 = vpack.c.bf16 %v1770_v23, %v1770_v23  ;;  %v3017_v32 = vpack.c.bf16 %v1834_v24, %v1834_v24  ;;  %v1771_v33 = vmax.f32 %v1643_v25, 0.0  ;;  %v1835_v34 = vmax.f32 %v1707_v26, 0.0  ;;  %v1044_v53 = vpop.f32.mrb[19].mxu0  ;;  %v1300_v54 = vpop.f32.mrb[19].mxu1 }
 0x183   : > { %2413 = vst.msk [vmem:[%s4057_s23 + $0x38] sm:$0xf] %vm2398_vm1, %v2955_v27  ;;  %2477 = vst.msk [vmem:[%s4057_s23 + $0x138] sm:$0xf] %vm2398_vm1, %v3019_v28  ;;  %v2956_v37 = vpack.c.bf16 %v1773_v29, %v1773_v29  ;;  %v3020_v38 = vpack.c.bf16 %v1837_v30, %v1837_v30  ;;  %v1513_v39 = vmul.f32 %v3155_v35, %v4035_v1 }
 0x184   : > { %v1577_v40 = vmul.f32 %v3219_v36, %v4035_v1  ;;  %2411 = vst.msk [vmem:[%s4057_s23 + $0x30] sm:$0xf] %vm2398_vm1, %v2953_v31  ;;  %2475 = vst.msk [vmem:[%s4057_s23 + $0x130] sm:$0xf] %vm2398_vm1, %v3017_v32  ;;  %v2954_v43 = vpack.c.bf16 %v1771_v33, %v1771_v33  ;;  %v3018_v44 = vpack.c.bf16 %v1835_v34, %v1835_v34 }
 0x185   : > { %v1511_v45 = vmul.f32 %v4035_v1, %v1041_v41  ;;  %v1575_v46 = vmul.f32 %v4035_v1, %v1297_v42  ;;  %2414 = vst.msk [vmem:[%s4057_s23 + $0x3c] sm:$0xf] %vm2398_vm1, %v2956_v37  ;;  %2478 = vst.msk [vmem:[%s4057_s23 + $0x13c] sm:$0xf] %vm2398_vm1, %v3020_v38  ;;  %v1648_v49 = vadd.f32 %v4037_v3, %v1513_v39 }
 0x186   : > { %v1712_v50 = vadd.f32 %v4037_v3, %v1577_v40  ;;  %v1514_v51 = vmul.f32 %v3156_v47, %v4035_v1  ;;  %v1578_v52 = vmul.f32 %v3220_v48, %v4035_v1  ;;  %2412 = vst.msk [vmem:[%s4057_s23 + $0x34] sm:$0xf] %vm2398_vm1, %v2954_v43  ;;  %2476 = vst.msk [vmem:[%s4057_s23 + $0x134] sm:$0xf] %vm2398_vm1, %v3018_v44 }
 0x187   : > { %v1646_v55 = vadd.f32 %v4037_v3, %v1511_v45  ;;  %v1710_v56 = vadd.f32 %v4037_v3, %v1575_v46  ;;  %v1512_v57 = vmul.f32 %v4035_v1, %v1044_v53  ;;  %v1576_v58 = vmul.f32 %v4035_v1, %v1300_v54  ;;  %v3159_v13 = vpop.f32.mrb[20].mxu0  ;;  %v3223_v14 = vpop.f32.mrb[20].mxu1 }
 0x188   : > { %v1776_v59 = vmax.f32 %v1648_v49, 0.0  ;;  %v1840_v60 = vmax.f32 %v1712_v50, 0.0  ;;  %v1649_v61 = vadd.f32 %v4037_v3, %v1514_v51  ;;  %v1713_v62 = vadd.f32 %v4037_v3, %v1578_v52  ;;  %v1057_v19 = vpop.f32.mrb[21].mxu0  ;;  %v1313_v20 = vpop.f32.mrb[21].mxu1 }
 0x189   : > { %v1774_v63 = vmax.f32 %v1646_v55, 0.0  ;;  %v1838_v0 = vmax.f32 %v1710_v56, 0.0  ;;  %v1647_v2 = vadd.f32 %v4037_v3, %v1512_v57  ;;  %v1711_v4 = vadd.f32 %v4037_v3, %v1576_v58  ;;  %v3160_v25 = vpop.f32.mrb[22].mxu0  ;;  %v3224_v26 = vpop.f32.mrb[22].mxu1 }
 0x18a   : > { %v2959_v5 = vpack.c.bf16 %v1776_v59, %v1776_v59  ;;  %v3023_v6 = vpack.c.bf16 %v1840_v60, %v1840_v60  ;;  %v1777_v7 = vmax.f32 %v1649_v61, 0.0  ;;  %v1841_v8 = vmax.f32 %v1713_v62, 0.0  ;;  %v1060_v31 = vpop.f32.mrb[23].mxu0  ;;  %v1316_v32 = vpop.f32.mrb[23].mxu1 }
 0x18b   : > { %v2957_v9 = vpack.c.bf16 %v1774_v63, %v1774_v63  ;;  %v3021_v10 = vpack.c.bf16 %v1838_v0, %v1838_v0  ;;  %v1775_v11 = vmax.f32 %v1647_v2, 0.0  ;;  %v1839_v12 = vmax.f32 %v1711_v4, 0.0 }
 0x18c   : > { %2417 = vst.msk [vmem:[%s4057_s23 + $0x48] sm:$0xf] %vm2398_vm1, %v2959_v5  ;;  %2481 = vst.msk [vmem:[%s4057_s23 + $0x148] sm:$0xf] %vm2398_vm1, %v3023_v6  ;;  %v2960_v15 = vpack.c.bf16 %v1777_v7, %v1777_v7  ;;  %v3024_v16 = vpack.c.bf16 %v1841_v8, %v1841_v8  ;;  %v1517_v17 = vmul.f32 %v3159_v13, %v4035_v1 }
 0x18d   : > { %v1581_v18 = vmul.f32 %v3223_v14, %v4035_v1  ;;  %2415 = vst.msk [vmem:[%s4057_s23 + $0x40] sm:$0xf] %vm2398_vm1, %v2957_v9  ;;  %2479 = vst.msk [vmem:[%s4057_s23 + $0x140] sm:$0xf] %vm2398_vm1, %v3021_v10  ;;  %v2958_v21 = vpack.c.bf16 %v1775_v11, %v1775_v11  ;;  %v3022_v22 = vpack.c.bf16 %v1839_v12, %v1839_v12 }
 0x18e   : > { %v1515_v23 = vmul.f32 %v4035_v1, %v1057_v19  ;;  %v1579_v24 = vmul.f32 %v4035_v1, %v1313_v20  ;;  %2418 = vst.msk [vmem:[%s4057_s23 + $0x4c] sm:$0xf] %vm2398_vm1, %v2960_v15  ;;  %2482 = vst.msk [vmem:[%s4057_s23 + $0x14c] sm:$0xf] %vm2398_vm1, %v3024_v16  ;;  %v1652_v27 = vadd.f32 %v4037_v3, %v1517_v17 }
 0x18f   : > { %v1716_v28 = vadd.f32 %v4037_v3, %v1581_v18  ;;  %v1518_v29 = vmul.f32 %v3160_v25, %v4035_v1  ;;  %v1582_v30 = vmul.f32 %v3224_v26, %v4035_v1  ;;  %2416 = vst.msk [vmem:[%s4057_s23 + $0x44] sm:$0xf] %vm2398_vm1, %v2958_v21  ;;  %2480 = vst.msk [vmem:[%s4057_s23 + $0x144] sm:$0xf] %vm2398_vm1, %v3022_v22  ;;  %v3163_v53 = vpop.f32.mrb[24].mxu0  ;;  %v3227_v54 = vpop.f32.mrb[24].mxu1 }
 0x190   : > { %v1650_v33 = vadd.f32 %v4037_v3, %v1515_v23  ;;  %v1714_v34 = vadd.f32 %v4037_v3, %v1579_v24  ;;  %v1516_v35 = vmul.f32 %v4035_v1, %v1060_v31  ;;  %v1580_v36 = vmul.f32 %v4035_v1, %v1316_v32  ;;  %v1073_v59 = vpop.f32.mrb[25].mxu0  ;;  %v1329_v60 = vpop.f32.mrb[25].mxu1 }
 0x191   : > { %v1780_v37 = vmax.f32 %v1652_v27, 0.0  ;;  %v1844_v38 = vmax.f32 %v1716_v28, 0.0  ;;  %v1653_v39 = vadd.f32 %v4037_v3, %v1518_v29  ;;  %v1717_v40 = vadd.f32 %v4037_v3, %v1582_v30  ;;  %v3164_v2 = vpop.f32.mrb[26].mxu0  ;;  %v3228_v4 = vpop.f32.mrb[26].mxu1 }
 0x192   : > { %v1778_v41 = vmax.f32 %v1650_v33, 0.0  ;;  %v1842_v42 = vmax.f32 %v1714_v34, 0.0  ;;  %v1651_v43 = vadd.f32 %v4037_v3, %v1516_v35  ;;  %v1715_v44 = vadd.f32 %v4037_v3, %v1580_v36  ;;  %v1076_v9 = vpop.f32.mrb[27].mxu0  ;;  %v1332_v10 = vpop.f32.mrb[27].mxu1 }
 0x193   : > { %v2963_v45 = vpack.c.bf16 %v1780_v37, %v1780_v37  ;;  %v3027_v46 = vpack.c.bf16 %v1844_v38, %v1844_v38  ;;  %v1781_v47 = vmax.f32 %v1653_v39, 0.0  ;;  %v1845_v48 = vmax.f32 %v1717_v40, 0.0 }
 0x194   : > { %v2961_v49 = vpack.c.bf16 %v1778_v41, %v1778_v41  ;;  %v3025_v50 = vpack.c.bf16 %v1842_v42, %v1842_v42  ;;  %v1779_v51 = vmax.f32 %v1651_v43, 0.0  ;;  %v1843_v52 = vmax.f32 %v1715_v44, 0.0 }
 0x195   : > { %2421 = vst.msk [vmem:[%s4057_s23 + $0x58] sm:$0xf] %vm2398_vm1, %v2963_v45  ;;  %2485 = vst.msk [vmem:[%s4057_s23 + $0x158] sm:$0xf] %vm2398_vm1, %v3027_v46  ;;  %v2964_v55 = vpack.c.bf16 %v1781_v47, %v1781_v47  ;;  %v3028_v56 = vpack.c.bf16 %v1845_v48, %v1845_v48  ;;  %v1521_v57 = vmul.f32 %v3163_v53, %v4035_v1 }
 0x196   : > { %v1585_v58 = vmul.f32 %v3227_v54, %v4035_v1  ;;  %2419 = vst.msk [vmem:[%s4057_s23 + $0x50] sm:$0xf] %vm2398_vm1, %v2961_v49  ;;  %2483 = vst.msk [vmem:[%s4057_s23 + $0x150] sm:$0xf] %vm2398_vm1, %v3025_v50  ;;  %v2962_v61 = vpack.c.bf16 %v1779_v51, %v1779_v51  ;;  %v3026_v62 = vpack.c.bf16 %v1843_v52, %v1843_v52 }
 0x197   : > { %v1519_v63 = vmul.f32 %v4035_v1, %v1073_v59  ;;  %v1583_v0 = vmul.f32 %v4035_v1, %v1329_v60  ;;  %2422 = vst.msk [vmem:[%s4057_s23 + $0x5c] sm:$0xf] %vm2398_vm1, %v2964_v55  ;;  %2486 = vst.msk [vmem:[%s4057_s23 + $0x15c] sm:$0xf] %vm2398_vm1, %v3028_v56  ;;  %v1656_v5 = vadd.f32 %v4037_v3, %v1521_v57  ;;  %v3167_v31 = vpop.f32.mrb[28].mxu0  ;;  %v3231_v32 = vpop.f32.mrb[28].mxu1 }
 0x198   : > { %v1720_v6 = vadd.f32 %v4037_v3, %v1585_v58  ;;  %v1522_v7 = vmul.f32 %v3164_v2, %v4035_v1  ;;  %v1586_v8 = vmul.f32 %v3228_v4, %v4035_v1  ;;  %2420 = vst.msk [vmem:[%s4057_s23 + $0x54] sm:$0xf] %vm2398_vm1, %v2962_v61  ;;  %2484 = vst.msk [vmem:[%s4057_s23 + $0x154] sm:$0xf] %vm2398_vm1, %v3026_v62  ;;  %v1089_v37 = vpop.f32.mrb[29].mxu0  ;;  %v1345_v38 = vpop.f32.mrb[29].mxu1 }
 0x199   : > { %v1654_v11 = vadd.f32 %v4037_v3, %v1519_v63  ;;  %v1718_v12 = vadd.f32 %v4037_v3, %v1583_v0  ;;  %v1520_v13 = vmul.f32 %v4035_v1, %v1076_v9  ;;  %v1584_v14 = vmul.f32 %v4035_v1, %v1332_v10  ;;  %v3168_v43 = vpop.f32.mrb[30].mxu0  ;;  %v3232_v44 = vpop.f32.mrb[30].mxu1 }
 0x19a   : > { %v1784_v15 = vmax.f32 %v1656_v5, 0.0  ;;  %v1848_v16 = vmax.f32 %v1720_v6, 0.0  ;;  %v1657_v17 = vadd.f32 %v4037_v3, %v1522_v7  ;;  %v1721_v18 = vadd.f32 %v4037_v3, %v1586_v8  ;;  %v1092_v49 = vpop.f32.mrb[31].mxu0  ;;  %v1348_v50 = vpop.f32.mrb[31].mxu1 }
 0x19b   : > { %v1782_v19 = vmax.f32 %v1654_v11, 0.0  ;;  %v1846_v20 = vmax.f32 %v1718_v12, 0.0  ;;  %v1655_v21 = vadd.f32 %v4037_v3, %v1520_v13  ;;  %v1719_v22 = vadd.f32 %v4037_v3, %v1584_v14 }
 0x19c   : > { %v2967_v23 = vpack.c.bf16 %v1784_v15, %v1784_v15  ;;  %v3031_v24 = vpack.c.bf16 %v1848_v16, %v1848_v16  ;;  %v1785_v25 = vmax.f32 %v1657_v17, 0.0  ;;  %v1849_v26 = vmax.f32 %v1721_v18, 0.0 }
 0x19d   : > { %v2965_v27 = vpack.c.bf16 %v1782_v19, %v1782_v19  ;;  %v3029_v28 = vpack.c.bf16 %v1846_v20, %v1846_v20  ;;  %v1783_v29 = vmax.f32 %v1655_v21, 0.0  ;;  %v1847_v30 = vmax.f32 %v1719_v22, 0.0 }
 0x19e   : > { %2425 = vst.msk [vmem:[%s4057_s23 + $0x68] sm:$0xf] %vm2398_vm1, %v2967_v23  ;;  %2489 = vst.msk [vmem:[%s4057_s23 + $0x168] sm:$0xf] %vm2398_vm1, %v3031_v24  ;;  %v2968_v33 = vpack.c.bf16 %v1785_v25, %v1785_v25  ;;  %v3032_v34 = vpack.c.bf16 %v1849_v26, %v1849_v26  ;;  %v1525_v35 = vmul.f32 %v3167_v31, %v4035_v1 }
 0x19f   : > { %v1589_v36 = vmul.f32 %v3231_v32, %v4035_v1  ;;  %2423 = vst.msk [vmem:[%s4057_s23 + $0x60] sm:$0xf] %vm2398_vm1, %v2965_v27  ;;  %2487 = vst.msk [vmem:[%s4057_s23 + $0x160] sm:$0xf] %vm2398_vm1, %v3029_v28  ;;  %v2966_v39 = vpack.c.bf16 %v1783_v29, %v1783_v29  ;;  %v3030_v40 = vpack.c.bf16 %v1847_v30, %v1847_v30  ;;  %v3171_v9 = vpop.f32.mrb[32].mxu0  ;;  %v3235_v10 = vpop.f32.mrb[32].mxu1 }
 0x1a0   : > { %v1523_v41 = vmul.f32 %v4035_v1, %v1089_v37  ;;  %v1587_v42 = vmul.f32 %v4035_v1, %v1345_v38  ;;  %2426 = vst.msk [vmem:[%s4057_s23 + $0x6c] sm:$0xf] %vm2398_vm1, %v2968_v33  ;;  %2490 = vst.msk [vmem:[%s4057_s23 + $0x16c] sm:$0xf] %vm2398_vm1, %v3032_v34  ;;  %v1660_v45 = vadd.f32 %v4037_v3, %v1525_v35  ;;  %v1105_v15 = vpop.f32.mrb[33].mxu0  ;;  %v1361_v16 = vpop.f32.mrb[33].mxu1 }
 0x1a1   : > { %v1724_v46 = vadd.f32 %v4037_v3, %v1589_v36  ;;  %v1526_v47 = vmul.f32 %v3168_v43, %v4035_v1  ;;  %v1590_v48 = vmul.f32 %v3232_v44, %v4035_v1  ;;  %2424 = vst.msk [vmem:[%s4057_s23 + $0x64] sm:$0xf] %vm2398_vm1, %v2966_v39  ;;  %2488 = vst.msk [vmem:[%s4057_s23 + $0x164] sm:$0xf] %vm2398_vm1, %v3030_v40  ;;  %v3172_v21 = vpop.f32.mrb[34].mxu0  ;;  %v3236_v22 = vpop.f32.mrb[34].mxu1 }
 0x1a2   : > { %v1658_v51 = vadd.f32 %v4037_v3, %v1523_v41  ;;  %v1722_v52 = vadd.f32 %v4037_v3, %v1587_v42  ;;  %v1524_v53 = vmul.f32 %v4035_v1, %v1092_v49  ;;  %v1588_v54 = vmul.f32 %v4035_v1, %v1348_v50  ;;  %v1108_v27 = vpop.f32.mrb[35].mxu0  ;;  %v1364_v28 = vpop.f32.mrb[35].mxu1 }
 0x1a3   : > { %v1788_v55 = vmax.f32 %v1660_v45, 0.0  ;;  %v1852_v56 = vmax.f32 %v1724_v46, 0.0  ;;  %v1661_v57 = vadd.f32 %v4037_v3, %v1526_v47  ;;  %v1725_v58 = vadd.f32 %v4037_v3, %v1590_v48 }
 0x1a4   : > { %v1786_v59 = vmax.f32 %v1658_v51, 0.0  ;;  %v1850_v60 = vmax.f32 %v1722_v52, 0.0  ;;  %v1659_v61 = vadd.f32 %v4037_v3, %v1524_v53  ;;  %v1723_v62 = vadd.f32 %v4037_v3, %v1588_v54 }
 0x1a5   : > { %v2971_v63 = vpack.c.bf16 %v1788_v55, %v1788_v55  ;;  %v3035_v0 = vpack.c.bf16 %v1852_v56, %v1852_v56  ;;  %v1789_v2 = vmax.f32 %v1661_v57, 0.0  ;;  %v1853_v4 = vmax.f32 %v1725_v58, 0.0 }
 0x1a6   : > { %v2969_v5 = vpack.c.bf16 %v1786_v59, %v1786_v59  ;;  %v3033_v6 = vpack.c.bf16 %v1850_v60, %v1850_v60  ;;  %v1787_v7 = vmax.f32 %v1659_v61, 0.0  ;;  %v1851_v8 = vmax.f32 %v1723_v62, 0.0 }
 0x1a7   : > { %2429 = vst.msk [vmem:[%s4057_s23 + $0x78] sm:$0xf] %vm2398_vm1, %v2971_v63  ;;  %2493 = vst.msk [vmem:[%s4057_s23 + $0x178] sm:$0xf] %vm2398_vm1, %v3035_v0  ;;  %v2972_v11 = vpack.c.bf16 %v1789_v2, %v1789_v2  ;;  %v3036_v12 = vpack.c.bf16 %v1853_v4, %v1853_v4  ;;  %v1529_v13 = vmul.f32 %v3171_v9, %v4035_v1  ;;  %v3175_v49 = vpop.f32.mrb[36].mxu0  ;;  %v3239_v50 = vpop.f32.mrb[36].mxu1 }
 0x1a8   : > { %v1593_v14 = vmul.f32 %v3235_v10, %v4035_v1  ;;  %2427 = vst.msk [vmem:[%s4057_s23 + $0x70] sm:$0xf] %vm2398_vm1, %v2969_v5  ;;  %2491 = vst.msk [vmem:[%s4057_s23 + $0x170] sm:$0xf] %vm2398_vm1, %v3033_v6  ;;  %v2970_v17 = vpack.c.bf16 %v1787_v7, %v1787_v7  ;;  %v3034_v18 = vpack.c.bf16 %v1851_v8, %v1851_v8  ;;  %v1121_v55 = vpop.f32.mrb[37].mxu0  ;;  %v1377_v56 = vpop.f32.mrb[37].mxu1 }
 0x1a9   : > { %v1527_v19 = vmul.f32 %v4035_v1, %v1105_v15  ;;  %v1591_v20 = vmul.f32 %v4035_v1, %v1361_v16  ;;  %2430 = vst.msk [vmem:[%s4057_s23 + $0x7c] sm:$0xf] %vm2398_vm1, %v2972_v11  ;;  %2494 = vst.msk [vmem:[%s4057_s23 + $0x17c] sm:$0xf] %vm2398_vm1, %v3036_v12  ;;  %v1664_v23 = vadd.f32 %v4037_v3, %v1529_v13  ;;  %v3176_v61 = vpop.f32.mrb[38].mxu0  ;;  %v3240_v62 = vpop.f32.mrb[38].mxu1 }
 0x1aa   : > { %v1728_v24 = vadd.f32 %v4037_v3, %v1593_v14  ;;  %v1530_v25 = vmul.f32 %v3172_v21, %v4035_v1  ;;  %v1594_v26 = vmul.f32 %v3236_v22, %v4035_v1  ;;  %2428 = vst.msk [vmem:[%s4057_s23 + $0x74] sm:$0xf] %vm2398_vm1, %v2970_v17  ;;  %2492 = vst.msk [vmem:[%s4057_s23 + $0x174] sm:$0xf] %vm2398_vm1, %v3034_v18  ;;  %v1124_v5 = vpop.f32.mrb[39].mxu0  ;;  %v1380_v6 = vpop.f32.mrb[39].mxu1 }
 0x1ab   : > { %v1662_v29 = vadd.f32 %v4037_v3, %v1527_v19  ;;  %v1726_v30 = vadd.f32 %v4037_v3, %v1591_v20  ;;  %v1528_v31 = vmul.f32 %v4035_v1, %v1108_v27  ;;  %v1592_v32 = vmul.f32 %v4035_v1, %v1364_v28 }
 0x1ac   : > { %v1792_v33 = vmax.f32 %v1664_v23, 0.0  ;;  %v1856_v34 = vmax.f32 %v1728_v24, 0.0  ;;  %v1665_v35 = vadd.f32 %v4037_v3, %v1530_v25  ;;  %v1729_v36 = vadd.f32 %v4037_v3, %v1594_v26 }
 0x1ad   : > { %v1790_v37 = vmax.f32 %v1662_v29, 0.0  ;;  %v1854_v38 = vmax.f32 %v1726_v30, 0.0  ;;  %v1663_v39 = vadd.f32 %v4037_v3, %v1528_v31  ;;  %v1727_v40 = vadd.f32 %v4037_v3, %v1592_v32 }
 0x1ae   : > { %v2975_v41 = vpack.c.bf16 %v1792_v33, %v1792_v33  ;;  %v3039_v42 = vpack.c.bf16 %v1856_v34, %v1856_v34  ;;  %v1793_v43 = vmax.f32 %v1665_v35, 0.0  ;;  %v1857_v44 = vmax.f32 %v1729_v36, 0.0 }
 0x1af   : > { %v2973_v45 = vpack.c.bf16 %v1790_v37, %v1790_v37  ;;  %v3037_v46 = vpack.c.bf16 %v1854_v38, %v1854_v38  ;;  %v1791_v47 = vmax.f32 %v1663_v39, 0.0  ;;  %v1855_v48 = vmax.f32 %v1727_v40, 0.0  ;;  %v3179_v27 = vpop.f32.mrb[40].mxu0  ;;  %v3243_v28 = vpop.f32.mrb[40].mxu1 }
 0x1b0   : > { %2433 = vst.msk [vmem:[%s4057_s23 + $0x88] sm:$0xf] %vm2398_vm1, %v2975_v41  ;;  %2497 = vst.msk [vmem:[%s4057_s23 + $0x188] sm:$0xf] %vm2398_vm1, %v3039_v42  ;;  %v2976_v51 = vpack.c.bf16 %v1793_v43, %v1793_v43  ;;  %v3040_v52 = vpack.c.bf16 %v1857_v44, %v1857_v44  ;;  %v1533_v53 = vmul.f32 %v3175_v49, %v4035_v1  ;;  %v1137_v33 = vpop.f32.mrb[41].mxu0  ;;  %v1393_v34 = vpop.f32.mrb[41].mxu1 }
 0x1b1   : > { %v1597_v54 = vmul.f32 %v3239_v50, %v4035_v1  ;;  %2431 = vst.msk [vmem:[%s4057_s23 + $0x80] sm:$0xf] %vm2398_vm1, %v2973_v45  ;;  %2495 = vst.msk [vmem:[%s4057_s23 + $0x180] sm:$0xf] %vm2398_vm1, %v3037_v46  ;;  %v2974_v57 = vpack.c.bf16 %v1791_v47, %v1791_v47  ;;  %v3038_v58 = vpack.c.bf16 %v1855_v48, %v1855_v48  ;;  %v3180_v39 = vpop.f32.mrb[42].mxu0  ;;  %v3244_v40 = vpop.f32.mrb[42].mxu1 }
 0x1b2   : > { %v1531_v59 = vmul.f32 %v4035_v1, %v1121_v55  ;;  %v1595_v60 = vmul.f32 %v4035_v1, %v1377_v56  ;;  %2434 = vst.msk [vmem:[%s4057_s23 + $0x8c] sm:$0xf] %vm2398_vm1, %v2976_v51  ;;  %2498 = vst.msk [vmem:[%s4057_s23 + $0x18c] sm:$0xf] %vm2398_vm1, %v3040_v52  ;;  %v1668_v63 = vadd.f32 %v4037_v3, %v1533_v53  ;;  %v1140_v45 = vpop.f32.mrb[43].mxu0  ;;  %v1396_v46 = vpop.f32.mrb[43].mxu1 }
 0x1b3   : > { %v1732_v0 = vadd.f32 %v4037_v3, %v1597_v54  ;;  %v1534_v2 = vmul.f32 %v3176_v61, %v4035_v1  ;;  %v1598_v4 = vmul.f32 %v3240_v62, %v4035_v1  ;;  %2432 = vst.msk [vmem:[%s4057_s23 + $0x84] sm:$0xf] %vm2398_vm1, %v2974_v57  ;;  %2496 = vst.msk [vmem:[%s4057_s23 + $0x184] sm:$0xf] %vm2398_vm1, %v3038_v58 }
 0x1b4   : > { %v1666_v7 = vadd.f32 %v4037_v3, %v1531_v59  ;;  %v1730_v8 = vadd.f32 %v4037_v3, %v1595_v60  ;;  %v1532_v9 = vmul.f32 %v4035_v1, %v1124_v5  ;;  %v1596_v10 = vmul.f32 %v4035_v1, %v1380_v6 }
 0x1b5   : > { %v1796_v11 = vmax.f32 %v1668_v63, 0.0  ;;  %v1860_v12 = vmax.f32 %v1732_v0, 0.0  ;;  %v1669_v13 = vadd.f32 %v4037_v3, %v1534_v2  ;;  %v1733_v14 = vadd.f32 %v4037_v3, %v1598_v4 }
 0x1b6   : > { %v1794_v15 = vmax.f32 %v1666_v7, 0.0  ;;  %v1858_v16 = vmax.f32 %v1730_v8, 0.0  ;;  %v1667_v17 = vadd.f32 %v4037_v3, %v1532_v9  ;;  %v1731_v18 = vadd.f32 %v4037_v3, %v1596_v10  ;;  %v4383_v7 = vld [vmem:[#allocation7] ss:$0 sm:$0xff] }
 0x1b7   : > { %v2979_v19 = vpack.c.bf16 %v1796_v11, %v1796_v11  ;;  %v3043_v20 = vpack.c.bf16 %v1860_v12, %v1860_v12  ;;  %v1797_v21 = vmax.f32 %v1669_v13, 0.0  ;;  %v1861_v22 = vmax.f32 %v1733_v14, 0.0  ;;  %v3183_v4 = vpop.f32.mrb[44].mxu0  ;;  %v3247_v5 = vpop.f32.mrb[44].mxu1 }
 0x1b8   : > { %v2977_v23 = vpack.c.bf16 %v1794_v15, %v1794_v15  ;;  %v3041_v24 = vpack.c.bf16 %v1858_v16, %v1858_v16  ;;  %v1795_v25 = vmax.f32 %v1667_v17, 0.0  ;;  %v1859_v26 = vmax.f32 %v1731_v18, 0.0  ;;  %v1153_v10 = vpop.f32.mrb[45].mxu0  ;;  %v1409_v11 = vpop.f32.mrb[45].mxu1  ;;  %v4397_v18 = vld [vmem:[#allocation8] ss:$0 sm:$0xff] }
 0x1b9   : > { %2437 = vst.msk [vmem:[%s4057_s23 + $0x98] sm:$0xf] %vm2398_vm1, %v2979_v19  ;;  %2501 = vst.msk [vmem:[%s4057_s23 + $0x198] sm:$0xf] %vm2398_vm1, %v3043_v20  ;;  %v2980_v29 = vpack.c.bf16 %v1797_v21, %v1797_v21  ;;  %v3044_v30 = vpack.c.bf16 %v1861_v22, %v1861_v22  ;;  %v1537_v31 = vmul.f32 %v3179_v27, %v4035_v1  ;;  %v3184_v16 = vpop.f32.mrb[46].mxu0  ;;  %v3248_v17 = vpop.f32.mrb[46].mxu1 }
 0x1ba   : > { %v1601_v32 = vmul.f32 %v3243_v28, %v4035_v1  ;;  %2435 = vst.msk [vmem:[%s4057_s23 + $0x90] sm:$0xf] %vm2398_vm1, %v2977_v23  ;;  %2499 = vst.msk [vmem:[%s4057_s23 + $0x190] sm:$0xf] %vm2398_vm1, %v3041_v24  ;;  %v2978_v35 = vpack.c.bf16 %v1795_v25, %v1795_v25  ;;  %v3042_v36 = vpack.c.bf16 %v1859_v26, %v1859_v26  ;;  %v1156_v23 = vpop.f32.mrb[47].mxu0  ;;  %v1412_v24 = vpop.f32.mrb[47].mxu1 }
 0x1bb   : > { %v1535_v37 = vmul.f32 %v4035_v1, %v1137_v33  ;;  %v1599_v38 = vmul.f32 %v4035_v1, %v1393_v34  ;;  %2438 = vst.msk [vmem:[%s4057_s23 + $0x9c] sm:$0xf] %vm2398_vm1, %v2980_v29  ;;  %2502 = vst.msk [vmem:[%s4057_s23 + $0x19c] sm:$0xf] %vm2398_vm1, %v3044_v30  ;;  %v1672_v41 = vadd.f32 %v4037_v3, %v1537_v31 }
 0x1bc   : > { %v1736_v42 = vadd.f32 %v4037_v3, %v1601_v32  ;;  %v1538_v43 = vmul.f32 %v3180_v39, %v4035_v1  ;;  %v1602_v44 = vmul.f32 %v3244_v40, %v4035_v1  ;;  %2436 = vst.msk [vmem:[%s4057_s23 + $0x94] sm:$0xf] %vm2398_vm1, %v2978_v35  ;;  %2500 = vst.msk [vmem:[%s4057_s23 + $0x194] sm:$0xf] %vm2398_vm1, %v3042_v36 }
 0x1bd   : > { %v1670_v47 = vadd.f32 %v4037_v3, %v1535_v37  ;;  %v1734_v48 = vadd.f32 %v4037_v3, %v1599_v38  ;;  %v1536_v49 = vmul.f32 %v4035_v1, %v1140_v45  ;;  %v1600_v50 = vmul.f32 %v4035_v1, %v1396_v46 }
 0x1be   : > { %v1800_v51 = vmax.f32 %v1672_v41, 0.0  ;;  %v1864_v52 = vmax.f32 %v1736_v42, 0.0  ;;  %v1673_v53 = vadd.f32 %v4037_v3, %v1538_v43  ;;  %v1737_v54 = vadd.f32 %v4037_v3, %v1602_v44 }
 0x1bf   : > { %v1798_v55 = vmax.f32 %v1670_v47, 0.0  ;;  %v1862_v56 = vmax.f32 %v1734_v48, 0.0  ;;  %v1671_v57 = vadd.f32 %v4037_v3, %v1536_v49  ;;  %v1735_v58 = vadd.f32 %v4037_v3, %v1600_v50  ;;  %v3187_v45 = vpop.f32.mrb[48].mxu0  ;;  %v3251_v46 = vpop.f32.mrb[48].mxu1 }
 0x1c0   : > { %v2983_v59 = vpack.c.bf16 %v1800_v51, %v1800_v51  ;;  %v3047_v60 = vpack.c.bf16 %v1864_v52, %v1864_v52  ;;  %v1801_v61 = vmax.f32 %v1673_v53, 0.0  ;;  %v1865_v62 = vmax.f32 %v1737_v54, 0.0  ;;  %v1169_v51 = vpop.f32.mrb[49].mxu0  ;;  %v1425_v52 = vpop.f32.mrb[49].mxu1 }
 0x1c1   : > { %v2981_v1 = vpack.c.bf16 %v1798_v55, %v1798_v55  ;;  %v3045_v63 = vpack.c.bf16 %v1862_v56, %v1862_v56  ;;  %v1799_v0 = vmax.f32 %v1671_v57, 0.0  ;;  %v1863_v2 = vmax.f32 %v1735_v58, 0.0  ;;  %v3188_v57 = vpop.f32.mrb[50].mxu0  ;;  %v3252_v58 = vpop.f32.mrb[50].mxu1 }
 0x1c2   : > { %2441 = vst.msk [vmem:[%s4057_s23 + $0xa8] sm:$0xf] %vm2398_vm1, %v2983_v59  ;;  %2505 = vst.msk [vmem:[%s4057_s23 + $0x1a8] sm:$0xf] %vm2398_vm1, %v3047_v60  ;;  %v2984_v6 = vpack.c.bf16 %v1801_v61, %v1801_v61  ;;  %v3048_v3 = vpack.c.bf16 %v1865_v62, %v1865_v62  ;;  %v1541_v8 = vmul.f32 %v4383_v7, %v3183_v4 }
 0x1c3   : > { %v1605_v9 = vmul.f32 %v4383_v7, %v3247_v5  ;;  %2439 = vst.msk [vmem:[%s4057_s23 + $0xa0] sm:$0xf] %vm2398_vm1, %v2981_v1  ;;  %2503 = vst.msk [vmem:[%s4057_s23 + $0x1a0] sm:$0xf] %vm2398_vm1, %v3045_v63  ;;  %v2982_v12 = vpack.c.bf16 %v1799_v0, %v1799_v0  ;;  %v3046_v13 = vpack.c.bf16 %v1863_v2, %v1863_v2  ;;  %v1172_v1 = vpop.f32.mrb[51].mxu0  ;;  %v1428_v63 = vpop.f32.mrb[51].mxu1 }
 0x1c4   : > { %v1539_v14 = vmul.f32 %v4383_v7, %v1153_v10  ;;  %v1603_v15 = vmul.f32 %v4383_v7, %v1409_v11  ;;  %2442 = vst.msk [vmem:[%s4057_s23 + $0xac] sm:$0xf] %vm2398_vm1, %v2984_v6  ;;  %2506 = vst.msk [vmem:[%s4057_s23 + $0x1ac] sm:$0xf] %vm2398_vm1, %v3048_v3  ;;  %v1676_v19 = vadd.f32 %v4397_v18, %v1541_v8 }
 0x1c5   : > { %v1740_v20 = vadd.f32 %v4397_v18, %v1605_v9  ;;  %v1542_v21 = vmul.f32 %v4383_v7, %v3184_v16  ;;  %v1606_v22 = vmul.f32 %v4383_v7, %v3248_v17  ;;  %2440 = vst.msk [vmem:[%s4057_s23 + $0xa4] sm:$0xf] %vm2398_vm1, %v2982_v12  ;;  %2504 = vst.msk [vmem:[%s4057_s23 + $0x1a4] sm:$0xf] %vm2398_vm1, %v3046_v13 }
 0x1c6   : > { %v1674_v25 = vadd.f32 %v4397_v18, %v1539_v14  ;;  %v1738_v26 = vadd.f32 %v4397_v18, %v1603_v15  ;;  %v1540_v27 = vmul.f32 %v4383_v7, %v1156_v23  ;;  %v1604_v28 = vmul.f32 %v4383_v7, %v1412_v24 }
 0x1c7   : > { %v1804_v29 = vmax.f32 %v1676_v19, 0.0  ;;  %v1868_v30 = vmax.f32 %v1740_v20, 0.0  ;;  %v1677_v31 = vadd.f32 %v4397_v18, %v1542_v21  ;;  %v1741_v32 = vadd.f32 %v4397_v18, %v1606_v22  ;;  %v3191_v23 = vpop.f32.mrb[52].mxu0  ;;  %v3255_v24 = vpop.f32.mrb[52].mxu1 }
 0x1c8   : > { %v1802_v33 = vmax.f32 %v1674_v25, 0.0  ;;  %v1866_v34 = vmax.f32 %v1738_v26, 0.0  ;;  %v1675_v35 = vadd.f32 %v4397_v18, %v1540_v27  ;;  %v1739_v36 = vadd.f32 %v4397_v18, %v1604_v28 }
 0x1c9   : > { %v2987_v37 = vpack.c.bf16 %v1804_v29, %v1804_v29  ;;  %v3051_v38 = vpack.c.bf16 %v1868_v30, %v1868_v30  ;;  %v1805_v39 = vmax.f32 %v1677_v31, 0.0  ;;  %v1869_v40 = vmax.f32 %v1741_v32, 0.0  ;;  %v1185_v29 = vpop.f32.mrb[53].mxu0  ;;  %v1441_v30 = vpop.f32.mrb[53].mxu1 }
 0x1ca   : > { %v2985_v41 = vpack.c.bf16 %v1802_v33, %v1802_v33  ;;  %v3049_v42 = vpack.c.bf16 %v1866_v34, %v1866_v34  ;;  %v1803_v43 = vmax.f32 %v1675_v35, 0.0  ;;  %v1867_v44 = vmax.f32 %v1739_v36, 0.0  ;;  %v3192_v35 = vpop.f32.mrb[54].mxu0  ;;  %v3256_v36 = vpop.f32.mrb[54].mxu1 }
 0x1cb   : > { %2445 = vst.msk [vmem:[%s4057_s23 + $0xb8] sm:$0xf] %vm2398_vm1, %v2987_v37  ;;  %2509 = vst.msk [vmem:[%s4057_s23 + $0x1b8] sm:$0xf] %vm2398_vm1, %v3051_v38  ;;  %v2988_v47 = vpack.c.bf16 %v1805_v39, %v1805_v39  ;;  %v3052_v48 = vpack.c.bf16 %v1869_v40, %v1869_v40  ;;  %v1545_v49 = vmul.f32 %v4383_v7, %v3187_v45 }
 0x1cc   : > { %v1609_v50 = vmul.f32 %v4383_v7, %v3251_v46  ;;  %2443 = vst.msk [vmem:[%s4057_s23 + $0xb0] sm:$0xf] %vm2398_vm1, %v2985_v41  ;;  %2507 = vst.msk [vmem:[%s4057_s23 + $0x1b0] sm:$0xf] %vm2398_vm1, %v3049_v42  ;;  %v2986_v53 = vpack.c.bf16 %v1803_v43, %v1803_v43  ;;  %v3050_v54 = vpack.c.bf16 %v1867_v44, %v1867_v44  ;;  %v1188_v41 = vpop.f32.mrb[55].mxu0  ;;  %v1444_v42 = vpop.f32.mrb[55].mxu1 }
 0x1cd   : > { %v1543_v55 = vmul.f32 %v4383_v7, %v1169_v51  ;;  %v1607_v56 = vmul.f32 %v4383_v7, %v1425_v52  ;;  %2446 = vst.msk [vmem:[%s4057_s23 + $0xbc] sm:$0xf] %vm2398_vm1, %v2988_v47  ;;  %2510 = vst.msk [vmem:[%s4057_s23 + $0x1bc] sm:$0xf] %vm2398_vm1, %v3052_v48  ;;  %v1680_v59 = vadd.f32 %v4397_v18, %v1545_v49 }
 0x1ce   : > { %v1744_v60 = vadd.f32 %v4397_v18, %v1609_v50  ;;  %v1546_v61 = vmul.f32 %v4383_v7, %v3188_v57  ;;  %v1610_v62 = vmul.f32 %v4383_v7, %v3252_v58  ;;  %2444 = vst.msk [vmem:[%s4057_s23 + $0xb4] sm:$0xf] %vm2398_vm1, %v2986_v53  ;;  %2508 = vst.msk [vmem:[%s4057_s23 + $0x1b4] sm:$0xf] %vm2398_vm1, %v3050_v54 }
 0x1cf   : > { %v1678_v0 = vadd.f32 %v4397_v18, %v1543_v55  ;;  %v1742_v2 = vadd.f32 %v4397_v18, %v1607_v56  ;;  %v1544_v4 = vmul.f32 %v4383_v7, %v1172_v1  ;;  %v1608_v5 = vmul.f32 %v4383_v7, %v1428_v63  ;;  %v3195_v1 = vpop.f32.mrb[56].mxu0  ;;  %v3259_v63 = vpop.f32.mrb[56].mxu1 }
 0x1d0   : > { %v1808_v6 = vmax.f32 %v1680_v59, 0.0  ;;  %v1872_v3 = vmax.f32 %v1744_v60, 0.0  ;;  %v1681_v8 = vadd.f32 %v4397_v18, %v1546_v61  ;;  %v1745_v9 = vadd.f32 %v4397_v18, %v1610_v62 }
 0x1d1   : > { %v1806_v10 = vmax.f32 %v1678_v0, 0.0  ;;  %v1870_v11 = vmax.f32 %v1742_v2, 0.0  ;;  %v1679_v12 = vadd.f32 %v4397_v18, %v1544_v4  ;;  %v1743_v13 = vadd.f32 %v4397_v18, %v1608_v5 }
 0x1d2   : > { %v2991_v14 = vpack.c.bf16 %v1808_v6, %v1808_v6  ;;  %v3055_v15 = vpack.c.bf16 %v1872_v3, %v1872_v3  ;;  %v1809_v16 = vmax.f32 %v1681_v8, 0.0  ;;  %v1873_v17 = vmax.f32 %v1745_v9, 0.0  ;;  %v1201_v6 = vpop.f32.mrb[57].mxu0  ;;  %v1457_v3 = vpop.f32.mrb[57].mxu1 }
 0x1d3   : > { %v2989_v19 = vpack.c.bf16 %v1806_v10, %v1806_v10  ;;  %v3053_v20 = vpack.c.bf16 %v1870_v11, %v1870_v11  ;;  %v1807_v21 = vmax.f32 %v1679_v12, 0.0  ;;  %v1871_v22 = vmax.f32 %v1743_v13, 0.0  ;;  %v3196_v12 = vpop.f32.mrb[58].mxu0  ;;  %v3260_v13 = vpop.f32.mrb[58].mxu1 }
 0x1d4   : > { %2449 = vst.msk [vmem:[%s4057_s23 + $0xc8] sm:$0xf] %vm2398_vm1, %v2991_v14  ;;  %2513 = vst.msk [vmem:[%s4057_s23 + $0x1c8] sm:$0xf] %vm2398_vm1, %v3055_v15  ;;  %v2992_v25 = vpack.c.bf16 %v1809_v16, %v1809_v16  ;;  %v3056_v26 = vpack.c.bf16 %v1873_v17, %v1873_v17  ;;  %v1549_v27 = vmul.f32 %v4383_v7, %v3191_v23 }
 0x1d5   : > { %v1613_v28 = vmul.f32 %v4383_v7, %v3255_v24  ;;  %2447 = vst.msk [vmem:[%s4057_s23 + $0xc0] sm:$0xf] %vm2398_vm1, %v2989_v19  ;;  %2511 = vst.msk [vmem:[%s4057_s23 + $0x1c0] sm:$0xf] %vm2398_vm1, %v3053_v20  ;;  %v2990_v31 = vpack.c.bf16 %v1807_v21, %v1807_v21  ;;  %v3054_v32 = vpack.c.bf16 %v1871_v22, %v1871_v22  ;;  %v1204_v19 = vpop.f32.mrb[59].mxu0  ;;  %v1460_v20 = vpop.f32.mrb[59].mxu1 }
 0x1d6   : > { %v1547_v33 = vmul.f32 %v4383_v7, %v1185_v29  ;;  %v1611_v34 = vmul.f32 %v4383_v7, %v1441_v30  ;;  %2450 = vst.msk [vmem:[%s4057_s23 + $0xcc] sm:$0xf] %vm2398_vm1, %v2992_v25  ;;  %2514 = vst.msk [vmem:[%s4057_s23 + $0x1cc] sm:$0xf] %vm2398_vm1, %v3056_v26  ;;  %v1684_v37 = vadd.f32 %v4397_v18, %v1549_v27 }
 0x1d7   : > { %v1748_v38 = vadd.f32 %v4397_v18, %v1613_v28  ;;  %v1550_v39 = vmul.f32 %v4383_v7, %v3192_v35  ;;  %v1614_v40 = vmul.f32 %v4383_v7, %v3256_v36  ;;  %2448 = vst.msk [vmem:[%s4057_s23 + $0xc4] sm:$0xf] %vm2398_vm1, %v2990_v31  ;;  %2512 = vst.msk [vmem:[%s4057_s23 + $0x1c4] sm:$0xf] %vm2398_vm1, %v3054_v32 }
 0x1d8   : > { %v1682_v43 = vadd.f32 %v4397_v18, %v1547_v33  ;;  %v1746_v44 = vadd.f32 %v4397_v18, %v1611_v34  ;;  %v1548_v45 = vmul.f32 %v4383_v7, %v1188_v41  ;;  %v1612_v46 = vmul.f32 %v4383_v7, %v1444_v42  ;;  %v3199_v41 = vpop.f32.mrb[60].mxu0  ;;  %v3263_v42 = vpop.f32.mrb[60].mxu1 }
 0x1d9   : > { %v1812_v47 = vmax.f32 %v1684_v37, 0.0  ;;  %v1876_v48 = vmax.f32 %v1748_v38, 0.0  ;;  %v1685_v49 = vadd.f32 %v4397_v18, %v1550_v39  ;;  %v1749_v50 = vadd.f32 %v4397_v18, %v1614_v40 }
 0x1da   : > { %v1810_v51 = vmax.f32 %v1682_v43, 0.0  ;;  %v1874_v52 = vmax.f32 %v1746_v44, 0.0  ;;  %v1683_v53 = vadd.f32 %v4397_v18, %v1548_v45  ;;  %v1747_v54 = vadd.f32 %v4397_v18, %v1612_v46 }
 0x1db   : > { %v2995_v55 = vpack.c.bf16 %v1812_v47, %v1812_v47  ;;  %v3059_v56 = vpack.c.bf16 %v1876_v48, %v1876_v48  ;;  %v1813_v57 = vmax.f32 %v1685_v49, 0.0  ;;  %v1877_v58 = vmax.f32 %v1749_v50, 0.0  ;;  %v1217_v47 = vpop.f32.mrb[61].mxu0  ;;  %v1473_v48 = vpop.f32.mrb[61].mxu1 }
 0x1dc   : > { %v2993_v59 = vpack.c.bf16 %v1810_v51, %v1810_v51  ;;  %v3057_v60 = vpack.c.bf16 %v1874_v52, %v1874_v52  ;;  %v1811_v61 = vmax.f32 %v1683_v53, 0.0  ;;  %v1875_v62 = vmax.f32 %v1747_v54, 0.0  ;;  %v3200_v53 = vpop.f32.mrb[62].mxu0  ;;  %v3264_v54 = vpop.f32.mrb[62].mxu1 }
 0x1dd   : > { %2453 = vst.msk [vmem:[%s4057_s23 + $0xd8] sm:$0xf] %vm2398_vm1, %v2995_v55  ;;  %2517 = vst.msk [vmem:[%s4057_s23 + $0x1d8] sm:$0xf] %vm2398_vm1, %v3059_v56  ;;  %v2996_v0 = vpack.c.bf16 %v1813_v57, %v1813_v57  ;;  %v3060_v2 = vpack.c.bf16 %v1877_v58, %v1877_v58  ;;  %v1553_v4 = vmul.f32 %v4383_v7, %v3195_v1 }
 0x1de   : > { %v1617_v5 = vmul.f32 %v4383_v7, %v3259_v63  ;;  %2451 = vst.msk [vmem:[%s4057_s23 + $0xd0] sm:$0xf] %vm2398_vm1, %v2993_v59  ;;  %2515 = vst.msk [vmem:[%s4057_s23 + $0x1d0] sm:$0xf] %vm2398_vm1, %v3057_v60  ;;  %v2994_v8 = vpack.c.bf16 %v1811_v61, %v1811_v61  ;;  %v3058_v9 = vpack.c.bf16 %v1875_v62, %v1875_v62  ;;  %v1220_v59 = vpop.f32.mrb[63].mxu0  ;;  %v1476_v60 = vpop.f32.mrb[63].mxu1 }
 0x1df   : > { %v1551_v10 = vmul.f32 %v4383_v7, %v1201_v6  ;;  %v1615_v11 = vmul.f32 %v4383_v7, %v1457_v3  ;;  %2454 = vst.msk [vmem:[%s4057_s23 + $0xdc] sm:$0xf] %vm2398_vm1, %v2996_v0  ;;  %2518 = vst.msk [vmem:[%s4057_s23 + $0x1dc] sm:$0xf] %vm2398_vm1, %v3060_v2  ;;  %v1688_v14 = vadd.f32 %v4397_v18, %v1553_v4 }
 0x1e0   : > { %v1752_v15 = vadd.f32 %v4397_v18, %v1617_v5  ;;  %v1554_v16 = vmul.f32 %v4383_v7, %v3196_v12  ;;  %v1618_v17 = vmul.f32 %v4383_v7, %v3260_v13  ;;  %2452 = vst.msk [vmem:[%s4057_s23 + $0xd4] sm:$0xf] %vm2398_vm1, %v2994_v8  ;;  %2516 = vst.msk [vmem:[%s4057_s23 + $0x1d4] sm:$0xf] %vm2398_vm1, %v3058_v9 }
 0x1e1   : > { %v1686_v21 = vadd.f32 %v4397_v18, %v1551_v10  ;;  %v1750_v22 = vadd.f32 %v4397_v18, %v1615_v11  ;;  %v1552_v23 = vmul.f32 %v4383_v7, %v1204_v19  ;;  %v1616_v24 = vmul.f32 %v4383_v7, %v1460_v20 }
 0x1e2   : > { %v1816_v25 = vmax.f32 %v1688_v14, 0.0  ;;  %v1880_v26 = vmax.f32 %v1752_v15, 0.0  ;;  %v1689_v27 = vadd.f32 %v4397_v18, %v1554_v16  ;;  %v1753_v28 = vadd.f32 %v4397_v18, %v1618_v17 }
 0x1e3   : > { %v1814_v29 = vmax.f32 %v1686_v21, 0.0  ;;  %v1878_v30 = vmax.f32 %v1750_v22, 0.0  ;;  %v1687_v31 = vadd.f32 %v4397_v18, %v1552_v23  ;;  %v1751_v32 = vadd.f32 %v4397_v18, %v1616_v24 }
 0x1e4   : > { %v2999_v33 = vpack.c.bf16 %v1816_v25, %v1816_v25  ;;  %v3063_v34 = vpack.c.bf16 %v1880_v26, %v1880_v26  ;;  %v1817_v35 = vmax.f32 %v1689_v27, 0.0  ;;  %v1881_v36 = vmax.f32 %v1753_v28, 0.0 }
 0x1e5   : > { %v2997_v37 = vpack.c.bf16 %v1814_v29, %v1814_v29  ;;  %v3061_v38 = vpack.c.bf16 %v1878_v30, %v1878_v30  ;;  %v1815_v39 = vmax.f32 %v1687_v31, 0.0  ;;  %v1879_v40 = vmax.f32 %v1751_v32, 0.0 }
 0x1e6   : > { %2457 = vst.msk [vmem:[%s4057_s23 + $0xe8] sm:$0xf] %vm2398_vm1, %v2999_v33  ;;  %2521 = vst.msk [vmem:[%s4057_s23 + $0x1e8] sm:$0xf] %vm2398_vm1, %v3063_v34  ;;  %v3000_v43 = vpack.c.bf16 %v1817_v35, %v1817_v35  ;;  %v3064_v44 = vpack.c.bf16 %v1881_v36, %v1881_v36  ;;  %v1557_v45 = vmul.f32 %v4383_v7, %v3199_v41 }
 0x1e7   : > { %v1621_v46 = vmul.f32 %v4383_v7, %v3263_v42  ;;  %2455 = vst.msk [vmem:[%s4057_s23 + $0xe0] sm:$0xf] %vm2398_vm1, %v2997_v37  ;;  %2519 = vst.msk [vmem:[%s4057_s23 + $0x1e0] sm:$0xf] %vm2398_vm1, %v3061_v38  ;;  %v2998_v49 = vpack.c.bf16 %v1815_v39, %v1815_v39  ;;  %v3062_v50 = vpack.c.bf16 %v1879_v40, %v1879_v40 }
 0x1e8   : > { %v1555_v51 = vmul.f32 %v4383_v7, %v1217_v47  ;;  %v1619_v52 = vmul.f32 %v4383_v7, %v1473_v48  ;;  %2458 = vst.msk [vmem:[%s4057_s23 + $0xec] sm:$0xf] %vm2398_vm1, %v3000_v43  ;;  %2522 = vst.msk [vmem:[%s4057_s23 + $0x1ec] sm:$0xf] %vm2398_vm1, %v3064_v44  ;;  %v1692_v55 = vadd.f32 %v4397_v18, %v1557_v45 }
 0x1e9   : > { %v1756_v56 = vadd.f32 %v4397_v18, %v1621_v46  ;;  %v1558_v57 = vmul.f32 %v4383_v7, %v3200_v53  ;;  %v1622_v58 = vmul.f32 %v4383_v7, %v3264_v54  ;;  %2456 = vst.msk [vmem:[%s4057_s23 + $0xe4] sm:$0xf] %vm2398_vm1, %v2998_v49  ;;  %2520 = vst.msk [vmem:[%s4057_s23 + $0x1e4] sm:$0xf] %vm2398_vm1, %v3062_v50 }
 0x1ea   : > { %v1690_v61 = vadd.f32 %v4397_v18, %v1555_v51  ;;  %v1754_v62 = vadd.f32 %v4397_v18, %v1619_v52  ;;  %v1556_v1 = vmul.f32 %v4383_v7, %v1220_v59  ;;  %v1620_v63 = vmul.f32 %v4383_v7, %v1476_v60 }
 0x1eb   : > { %v1820_v0 = vmax.f32 %v1692_v55, 0.0  ;;  %v1884_v2 = vmax.f32 %v1756_v56, 0.0  ;;  %v1693_v4 = vadd.f32 %v4397_v18, %v1558_v57  ;;  %v1757_v5 = vadd.f32 %v4397_v18, %v1622_v58 }
 0x1ec   : > { %v1818_v6 = vmax.f32 %v1690_v61, 0.0  ;;  %v1882_v3 = vmax.f32 %v1754_v62, 0.0  ;;  %v1691_v8 = vadd.f32 %v4397_v18, %v1556_v1  ;;  %v1755_v9 = vadd.f32 %v4397_v18, %v1620_v63 }
 0x1ed   : > { %v3003_v10 = vpack.c.bf16 %v1820_v0, %v1820_v0  ;;  %v3067_v7 = vpack.c.bf16 %v1884_v2, %v1884_v2  ;;  %v1821_v11 = vmax.f32 %v1693_v4, 0.0  ;;  %v1885_v12 = vmax.f32 %v1757_v5, 0.0 }
 0x1ee   : > { %v3001_v13 = vpack.c.bf16 %v1818_v6, %v1818_v6  ;;  %v3065_v14 = vpack.c.bf16 %v1882_v3, %v1882_v3  ;;  %v1819_v15 = vmax.f32 %v1691_v8, 0.0  ;;  %v1883_v16 = vmax.f32 %v1755_v9, 0.0 }
 0x1ef   : > { %2461 = vst.msk [vmem:[%s4057_s23 + $0xf8] sm:$0xf] %vm2398_vm1, %v3003_v10  ;;  %2525 = vst.msk [vmem:[%s4057_s23 + $0x1f8] sm:$0xf] %vm2398_vm1, %v3067_v7  ;;  %v3004_v18 = vpack.c.bf16 %v1821_v11, %v1821_v11  ;;  %v3068_v17 = vpack.c.bf16 %v1885_v12, %v1885_v12 }
 0x1f0   : > { %2459 = vst.msk [vmem:[%s4057_s23 + $0xf0] sm:$0xf] %vm2398_vm1, %v3001_v13  ;;  %2523 = vst.msk [vmem:[%s4057_s23 + $0x1f0] sm:$0xf] %vm2398_vm1, %v3065_v14  ;;  %v3002_v19 = vpack.c.bf16 %v1819_v15, %v1819_v15  ;;  %v3066_v20 = vpack.c.bf16 %v1883_v16, %v1883_v16 }
 0x1f1   : > { %2462 = vst.msk [vmem:[%s4057_s23 + $0xfc] sm:$0xf] %vm2398_vm1, %v3004_v18  ;;  %2526 = vst.msk [vmem:[%s4057_s23 + $0x1fc] sm:$0xf] %vm2398_vm1, %v3068_v17 }
 0x1f2   : > { %2460 = vst.msk [vmem:[%s4057_s23 + $0xf4] sm:$0xf] %vm2398_vm1, %v3002_v19  ;;  %2524 = vst.msk [vmem:[%s4057_s23 + $0x1f4] sm:$0xf] %vm2398_vm1, %v3066_v20 }
 0x1f3   : > { %3558 = shalt.err (!%p3555_p0)
}
 0x1f4   : > { %s3559_s9 = scalar_lea.hbm %s4552_s7, 8192  ;;  %s3563_s21 = scalar_lea.hbm %s4619_s4, 16384 }
 0x1f5   : > { %p3560_p4 = scmp.ne.s32.totalorder %s4552_s7, %s3559_s9  ;;  %p3564_p12 = scmp.lt.u32.totalorder %s4552_s7, %s4619_s4 }
 0x1f6   : > { %p3565_p1 = scmp.lt.u32.totalorder %s3563_s21, %s3559_s9  ;;  %p3567_p13 = scmp.lt.u32.totalorder %s3559_s9, %s4552_s7 }
 0x1f7   : > { %p3561_p2 = pnand %p3560_p4, %p3826_p10 }
 0x1f8   : > { %p3566_p11 = por %p3565_p1, %p3564_p12 }
 0x1f9   : > { %p3562_p8 = pneg %p3561_p2 }
 0x1fa   : > { %p3568_p6 = por %p3567_p13, %p3566_p11 }
 0x1fc   : > { %p3569_p3 = pnand %p3568_p6, %p3562_p8 }
 0x1fe   : > { %3572 = shalt.err (!%p3569_p3)
}
 0x1ff   : > { %s3644_s23 = smov 64   ;;  %s3645_s25 = smov 4  }
 0x200   : > { %3281 = dma.vmem_to_hbm [thread:$0]  (%p3826_p10), %s4554_s27, 8192, %s4552_s7, %s2528_s24, %s3644_s23, %s3644_s23, %s3645_s25  }
 0x201 PF: > { %s4639_s18 = sld [smem:[#allocation15_spill]]  ;;  %s2557_s5 = sand.u32 1, %s3615_s15  }
 0x202   : > { %p4641_p7 = scmp.ge.s32.totalorder %s3635_s20, 2  ;;  %s2558_s6 = scalar_lea.sflag [#allocation4], %s2557_s5 }
 0x207   : > { %p4640_p5 = scmp.ne.s32.totalorder %s4639_s18, 0 }
 0x209   : > { %p3298_p9 = pnand %p4641_p7, %p4640_p5 }
 0x20b   : > { %3610 = dma.done.wait (!%p3298_p9), %s2558_s6, 8192  }
 0x20c   : > { %3612 = vsyncadd (!%p3298_p9), %s2558_s6, 4294959104  ;;  %s22_s20 = sadd.s32 1, %s3635_s20   ;;  %s4642_s15 = smov %s3619_s16 }
 0x20d   : > { %p19_p0 = scmp.ge.s32.totalorder %s22_s20, 4   ;;  %s4643_s16 = smov %s3623_s17 }
 0x20e   : > { %s4644_s17 = smov %s3838_s22  ;;  %s4645_s18 = smov %s3631_s19 }
 0x20f   : > { %s4646_s19 = smov %s4648_s11  ;;  %21 = sbr.rel (!%p19_p0) target bundleno = 8 (0x8), region = 96 }
 0x216   :  { %2563 = vsyncpa [#allocation3], 1 }
 0x217   :  { %2565 = vsyncpa [#allocation3 + $0x1], 1 }
 0x218   :  { %2566 = vsyncpa [#allocation6], 1 }
 0x219   :  { %2567 = vsyncpa [#allocation9], 1 }
 0x21a   :  { %2568 = vsyncpa [#allocation4], 1 }
 0x21b   :  { %2570 = vsyncpa [#allocation4 + $0x1], 1 }

</bundles_post_ra>
